<compile_context>
chip_gen: v7x
topology: tpu7x:2x2x1
jax: 0.10.0
libtpu: 0.0.40
codegen_flags: <defaults>
</compile_context>

<pallas_src>
import math
import functools

import jax
import jax.numpy as jnp
import numpy as np
from jax import lax
from jax.experimental import pallas as pl
from jax.experimental.pallas import tpu as pltpu


def _mha_kernel(q_ref, h_ref, wq_ref, wk_ref, wv_ref, wo_ref, o_ref, *,
                norm_factor, n_heads, key_dim, value_dim,
                block_b, n_query, target_size):
    # All-head projections for block_b batch elements at once: three lane-dense
    # MXU matmuls with f32 accumulation.
    # NOTE: for large D / seq on v5e/v6e/v7x, cast the matmul operands to
    # bfloat16 (keep preferred_element_type=f32) for MXU peak; kept f32 here so
    # the 1e-5 self-check below holds.
    Q = jnp.dot(q_ref[...], wq_ref[...], preferred_element_type=jnp.float32)  # (bb*nq, H*kd)
    K = jnp.dot(h_ref[...], wk_ref[...], preferred_element_type=jnp.float32)  # (bb*T,  H*kd)
    V = jnp.dot(h_ref[...], wv_ref[...], preferred_element_type=jnp.float32)  # (bb*T,  H*vd)

    # Per-(batch, head) attention (softmax is per head over T) — unrolled at
    # trace time over static slices of the projected tensors.
    per_batch = []
    for b in range(block_b):
        Qb = Q[b * n_query:(b + 1) * n_query, :]
        Kb = K[b * target_size:(b + 1) * target_size, :]
        Vb = V[b * target_size:(b + 1) * target_size, :]
        head_outs = []
        for hd in range(n_heads):
            Qh = Qb[:, hd * key_dim:(hd + 1) * key_dim]        # (nq, kd)
            Kh = Kb[:, hd * key_dim:(hd + 1) * key_dim]        # (T, kd)
            Vh = Vb[:, hd * value_dim:(hd + 1) * value_dim]    # (T, vd)

            # Contract the kd axis directly (no K^T materialization).
            U = norm_factor * lax.dot_general(
                Qh, Kh, (((1,), (1,)), ((), ())),
                preferred_element_type=jnp.float32)            # (nq, T)

            # TODO(synk): optional `mask` argument (set -inf before softmax,
            # zero after) is not wired through; this is the mask=None path.

            U = U - jnp.max(U, axis=-1, keepdims=True)
            e = jnp.exp(U)
            # approx=True would offload the divide to the EUP (free slot);
            # exact kept so the 1e-5 correctness check passes.
            attn = e * pl.reciprocal(jnp.sum(e, axis=-1, keepdims=True),
                                     approx=False)
            head_outs.append(
                jnp.dot(attn, Vh, preferred_element_type=jnp.float32))  # (nq, vd)
        per_batch.append(jnp.concatenate(head_outs, axis=-1))           # (nq, H*vd)

    # Head + batch recombination: one matmul with the flattened out-projection.
    heads_cat = jnp.concatenate(per_batch, axis=0)                       # (bb*nq, H*vd)
    out = jnp.dot(heads_cat, wo_ref[...],
                  preferred_element_type=jnp.float32)                    # (bb*nq, D)
    o_ref[...] = out.astype(o_ref.dtype)


def _pick_block_b(batch, n_query, target_size, n_heads, max_unroll=64):
    """Largest divisor of `batch` that keeps the trace-time unroll (bb * H)
    bounded and the sublane block dims 8-aligned (or equal to the full array)."""
    best = 1
    for bb in range(1, batch + 1):
        if batch % bb:
            continue
        if bb * n_heads > max_unroll:
            break
        aligned = (bb * n_query) % 8 == 0 and (bb * target_size) % 8 == 0
        if bb == batch or aligned:
            best = bb
    return best


def multi_head_attention(q, h, w_query, w_key, w_value, w_out):
    """q: (B, n_query, D), h: (B, T, D). Returns (B, n_query, D)."""
    B, n_query, D = q.shape
    _, T, _ = h.shape
    n_heads, _, key_dim = w_query.shape
    value_dim = w_value.shape[-1]
    norm_factor = 1.0 / math.sqrt(key_dim)

    # Head-concatenated, lane-dense weight layouts (built once in the wrapper):
    #   wq_cat[:, h*kd:(h+1)*kd] == w_query[h]      -> (D, H*kd)
    #   wo_cat == w_out.reshape(H*vd, D)            -> matches torch's
    #   heads.permute(1,2,0,3).reshape(-1, H*vd) @ w_out.view(-1, D)
    wq_cat = jnp.transpose(w_query, (1, 0, 2)).reshape(D, n_heads * key_dim)
    wk_cat = jnp.transpose(w_key, (1, 0, 2)).reshape(D, n_heads * key_dim)
    wv_cat = jnp.transpose(w_value, (1, 0, 2)).reshape(D, n_heads * value_dim)
    wo_cat = w_out.reshape(n_heads * value_dim, D)

    block_b = _pick_block_b(B, n_query, T, n_heads)
    if block_b != B and ((block_b * n_query) % 8 or (block_b * T) % 8):
        # No 8-aligned partial block exists: take the full batch in one step
        # (full-array blocks are always legal).
        block_b = B

    # Flatten batch into rows (same flattening torch does with q_flat/h_flat);
    # contiguous reshape outside the kernel is free.
    q_flat = q.reshape(B * n_query, D)
    h_flat = h.reshape(B * T, D)

    kernel = functools.partial(
        _mha_kernel, norm_factor=norm_factor, n_heads=n_heads,
        key_dim=key_dim, value_dim=value_dim,
        block_b=block_b, n_query=n_query, target_size=T)

    out_flat = pl.pallas_call(
        kernel,
        out_shape=jax.ShapeDtypeStruct((B * n_query, D), q.dtype),
        grid_spec=pltpu.PrefetchScalarGridSpec(
            num_scalar_prefetch=0,
            grid=(B // block_b,),
            in_specs=[
                pl.BlockSpec((block_b * n_query, D), lambda b: (b, 0)),       # q rows
                pl.BlockSpec((block_b * T, D), lambda b: (b, 0)),             # h rows
                pl.BlockSpec((D, n_heads * key_dim), lambda b: (0, 0)),       # Wq cat
                pl.BlockSpec((D, n_heads * key_dim), lambda b: (0, 0)),       # Wk cat
                pl.BlockSpec((D, n_heads * value_dim), lambda b: (0, 0)),     # Wv cat
                pl.BlockSpec((n_heads * value_dim, D), lambda b: (0, 0)),     # Wo cat
            ],
            out_specs=pl.BlockSpec((block_b * n_query, D), lambda b: (b, 0)),
        ),
        compiler_params=pltpu.CompilerParams(
            dimension_semantics=("parallel",)),
    )(q_flat, h_flat, wq_cat, wk_cat, wv_cat, wo_cat)

    return out_flat.reshape(B, n_query, D)


def _reference(q, h, w_query, w_key, w_value, w_out):
    """Pure-JAX transcription of the PyTorch forward (mask=None)."""
    n_heads, D, key_dim = w_query.shape
    norm = 1.0 / math.sqrt(key_dim)
    Q = jnp.einsum("bnd,hdk->hbnk", q, w_query)
    K = jnp.einsum("btd,hdk->hbtk", h, w_key)
    V = jnp.einsum("btd,hdv->hbtv", h, w_value)
    U = norm * jnp.einsum("hbnk,hbtk->hbnt", Q, K)
    attn = jax.nn.softmax(U, axis=-1)
    heads = jnp.einsum("hbnt,hbtv->hbnv", attn, V)
    out = jnp.einsum("hbnv,hve->bne", heads, w_out)
    return out


def init_params(key, embedding_dim=32, n_heads=8, dtype=jnp.float32):
    value_dim = embedding_dim // n_heads
    key_dim = value_dim
    ks = jax.random.split(key, 4)

    def uni(k, shape):
        stdv = 1.0 / math.sqrt(shape[-1])
        return jax.random.uniform(k, shape, dtype=dtype, minval=-stdv, maxval=stdv)

    w_query = uni(ks[0], (n_heads, embedding_dim, key_dim))
    w_key = uni(ks[1], (n_heads, embedding_dim, key_dim))
    w_value = uni(ks[2], (n_heads, embedding_dim, value_dim))
    w_out = uni(ks[3], (n_heads, value_dim, embedding_dim))
    return w_query, w_key, w_value, w_out


if __name__ == "__main__":
    key = jax.random.PRNGKey(0)
    B, n_query, embedding_dim, n_heads = 2, 8, 32, 8

    k_params, k_q = jax.random.split(key)
    w_query, w_key, w_value, w_out = init_params(
        k_params, embedding_dim=embedding_dim, n_heads=n_heads)

    q = jax.random.normal(k_q, (B, n_query, embedding_dim), dtype=jnp.float32)
    h = q  # forward(q, h=None) => h = q

    out = multi_head_attention(q, h, w_query, w_key, w_value, w_out)
    out = jax.block_until_ready(out)

    ref = _reference(q, h, w_query, w_key, w_value, w_out)
    np.testing.assert_allclose(np.asarray(out), np.asarray(ref), rtol=1e-5, atol=1e-5)

    print("KERNEL_OK")
</pallas_src>

<mosaic_0001>
module attributes {stable_mosaic.version = 11 : i64} {
  func.func @_mha_kernel(%arg0: i32, %arg1: memref<16x32xf32, #tpu.memory_space<vmem>>, %arg2: memref<16x32xf32, #tpu.memory_space<vmem>>, %arg3: memref<32x32xf32, #tpu.memory_space<vmem>>, %arg4: memref<32x32xf32, #tpu.memory_space<vmem>>, %arg5: memref<32x32xf32, #tpu.memory_space<vmem>>, %arg6: memref<32x32xf32, #tpu.memory_space<vmem>>, %arg7: memref<16x32xf32, #tpu.memory_space<vmem>>) attributes {dimension_semantics = [#tpu.dimension_semantics<parallel>], iteration_bounds = array<i64: 1>, scalar_prefetch = 0 : i64, scratch_operands = 0 : i64, tpu.core_type = #tpu.core_type<tc>, window_params = [{transform_indices = @transform_0, window_bounds = array<i64: 16, 32>}, {transform_indices = @transform_1, window_bounds = array<i64: 16, 32>}, {pipeline_mode = #tpu.pipeline_mode<synchronous>, transform_indices = @transform_2, window_bounds = array<i64: 32, 32>}, {pipeline_mode = #tpu.pipeline_mode<synchronous>, transform_indices = @transform_3, window_bounds = array<i64: 32, 32>}, {pipeline_mode = #tpu.pipeline_mode<synchronous>, transform_indices = @transform_4, window_bounds = array<i64: 32, 32>}, {pipeline_mode = #tpu.pipeline_mode<synchronous>, transform_indices = @transform_5, window_bounds = array<i64: 32, 32>}, {transform_indices = @transform_6, window_bounds = array<i64: 16, 32>}]} {
    %c0 = arith.constant 0 : index
    %c0_0 = arith.constant 0 : index
    %0 = vector.load %arg1[%c0, %c0_0] : memref<16x32xf32, #tpu.memory_space<vmem>>, vector<16x32xf32>
    %c0_1 = arith.constant 0 : index
    %c0_2 = arith.constant 0 : index
    %1 = vector.load %arg3[%c0_1, %c0_2] : memref<32x32xf32, #tpu.memory_space<vmem>>, vector<32x32xf32>
    %cst = arith.constant dense<0.000000e+00> : vector<16x32xf32>
    %2 = tpu.matmul %0, %1, %cst {dimension_numbers = #tpu.dot_dimension_numbers<[1], [0], [0], [1], [0, 0, 1, 1], [], []>} : vector<16x32xf32>, vector<32x32xf32>, vector<16x32xf32> -> vector<16x32xf32>
    %c0_3 = arith.constant 0 : index
    %c0_4 = arith.constant 0 : index
    %3 = vector.load %arg2[%c0_3, %c0_4] : memref<16x32xf32, #tpu.memory_space<vmem>>, vector<16x32xf32>
    %c0_5 = arith.constant 0 : index
    %c0_6 = arith.constant 0 : index
    %4 = vector.load %arg4[%c0_5, %c0_6] : memref<32x32xf32, #tpu.memory_space<vmem>>, vector<32x32xf32>
    %cst_7 = arith.constant dense<0.000000e+00> : vector<16x32xf32>
    %5 = tpu.matmul %3, %4, %cst_7 {dimension_numbers = #tpu.dot_dimension_numbers<[1], [0], [0], [1], [0, 0, 1, 1], [], []>} : vector<16x32xf32>, vector<32x32xf32>, vector<16x32xf32> -> vector<16x32xf32>
    %c0_8 = arith.constant 0 : index
    %c0_9 = arith.constant 0 : index
    %6 = vector.load %arg2[%c0_8, %c0_9] : memref<16x32xf32, #tpu.memory_space<vmem>>, vector<16x32xf32>
    %c0_10 = arith.constant 0 : index
    %c0_11 = arith.constant 0 : index
    %7 = vector.load %arg5[%c0_10, %c0_11] : memref<32x32xf32, #tpu.memory_space<vmem>>, vector<32x32xf32>
    %cst_12 = arith.constant dense<0.000000e+00> : vector<16x32xf32>
    %8 = tpu.matmul %6, %7, %cst_12 {dimension_numbers = #tpu.dot_dimension_numbers<[1], [0], [0], [1], [0, 0, 1, 1], [], []>} : vector<16x32xf32>, vector<32x32xf32>, vector<16x32xf32> -> vector<16x32xf32>
    %9 = vector.extract_strided_slice %2 {offsets = [0, 0], sizes = [8, 32], strides = [1, 1]} : vector<16x32xf32> to vector<8x32xf32>
    %10 = vector.extract_strided_slice %5 {offsets = [0, 0], sizes = [8, 32], strides = [1, 1]} : vector<16x32xf32> to vector<8x32xf32>
    %11 = vector.extract_strided_slice %8 {offsets = [0, 0], sizes = [8, 32], strides = [1, 1]} : vector<16x32xf32> to vector<8x32xf32>
    %12 = vector.extract_strided_slice %9 {offsets = [0, 0], sizes = [8, 4], strides = [1, 1]} : vector<8x32xf32> to vector<8x4xf32>
    %13 = vector.extract_strided_slice %10 {offsets = [0, 0], sizes = [8, 4], strides = [1, 1]} : vector<8x32xf32> to vector<8x4xf32>
    %14 = vector.extract_strided_slice %11 {offsets = [0, 0], sizes = [8, 4], strides = [1, 1]} : vector<8x32xf32> to vector<8x4xf32>
    %cst_13 = arith.constant dense<0.000000e+00> : vector<8x8xf32>
    %15 = tpu.matmul %12, %13, %cst_13 {dimension_numbers = #tpu.dot_dimension_numbers<[1], [1], [0], [0], [0, 0, 1, 0], [], []>} : vector<8x4xf32>, vector<8x4xf32>, vector<8x8xf32> -> vector<8x8xf32>
    %cst_14 = arith.constant 5.000000e-01 : f32
    %16 = vector.broadcast %cst_14 : f32 to vector<8x8xf32>
    %17 = arith.mulf %16, %15 : vector<8x8xf32>
    %cst_15 = arith.constant dense<0xFF800000> : vector<8xf32>
    %18 = vector.multi_reduction <maximumf>, %17, %cst_15 [1] : vector<8x8xf32> to vector<8xf32>
    %19 = vector.shape_cast %18 : vector<8xf32> to vector<8x1xf32>
    %20 = vector.broadcast %19 : vector<8x1xf32> to vector<8x8xf32>
    %21 = arith.subf %17, %20 : vector<8x8xf32>
    %22 = math.exp %21 : vector<8x8xf32>
    %cst_16 = arith.constant dense<0.000000e+00> : vector<8xf32>
    %23 = vector.multi_reduction <add>, %22, %cst_16 [1] : vector<8x8xf32> to vector<8xf32>
    %24 = vector.shape_cast %23 : vector<8xf32> to vector<8x1xf32>
    %25 = tpu.reciprocal %24 : vector<8x1xf32> -> vector<8x1xf32>
    %26 = vector.broadcast %25 : vector<8x1xf32> to vector<8x8xf32>
    %27 = arith.mulf %22, %26 : vector<8x8xf32>
    %cst_17 = arith.constant dense<0.000000e+00> : vector<8x4xf32>
    %28 = tpu.matmul %27, %14, %cst_17 {dimension_numbers = #tpu.dot_dimension_numbers<[1], [0], [0], [1], [0, 0, 1, 1], [], []>} : vector<8x8xf32>, vector<8x4xf32>, vector<8x4xf32> -> vector<8x4xf32>
    %29 = vector.extract_strided_slice %9 {offsets = [0, 4], sizes = [8, 4], strides = [1, 1]} : vector<8x32xf32> to vector<8x4xf32>
    %30 = vector.extract_strided_slice %10 {offsets = [0, 4], sizes = [8, 4], strides = [1, 1]} : vector<8x32xf32> to vector<8x4xf32>
    %31 = vector.extract_strided_slice %11 {offsets = [0, 4], sizes = [8, 4], strides = [1, 1]} : vector<8x32xf32> to vector<8x4xf32>
    %cst_18 = arith.constant dense<0.000000e+00> : vector<8x8xf32>
    %32 = tpu.matmul %29, %30, %cst_18 {dimension_numbers = #tpu.dot_dimension_numbers<[1], [1], [0], [0], [0, 0, 1, 0], [], []>} : vector<8x4xf32>, vector<8x4xf32>, vector<8x8xf32> -> vector<8x8xf32>
    %cst_19 = arith.constant 5.000000e-01 : f32
    %33 = vector.broadcast %cst_19 : f32 to vector<8x8xf32>
    %34 = arith.mulf %33, %32 : vector<8x8xf32>
    %cst_20 = arith.constant dense<0xFF800000> : vector<8xf32>
    %35 = vector.multi_reduction <maximumf>, %34, %cst_20 [1] : vector<8x8xf32> to vector<8xf32>
    %36 = vector.shape_cast %35 : vector<8xf32> to vector<8x1xf32>
    %37 = vector.broadcast %36 : vector<8x1xf32> to vector<8x8xf32>
    %38 = arith.subf %34, %37 : vector<8x8xf32>
    %39 = math.exp %38 : vector<8x8xf32>
    %cst_21 = arith.constant dense<0.000000e+00> : vector<8xf32>
    %40 = vector.multi_reduction <add>, %39, %cst_21 [1] : vector<8x8xf32> to vector<8xf32>
    %41 = vector.shape_cast %40 : vector<8xf32> to vector<8x1xf32>
    %42 = tpu.reciprocal %41 : vector<8x1xf32> -> vector<8x1xf32>
    %43 = vector.broadcast %42 : vector<8x1xf32> to vector<8x8xf32>
    %44 = arith.mulf %39, %43 : vector<8x8xf32>
    %cst_22 = arith.constant dense<0.000000e+00> : vector<8x4xf32>
    %45 = tpu.matmul %44, %31, %cst_22 {dimension_numbers = #tpu.dot_dimension_numbers<[1], [0], [0], [1], [0, 0, 1, 1], [], []>} : vector<8x8xf32>, vector<8x4xf32>, vector<8x4xf32> -> vector<8x4xf32>
    %46 = vector.extract_strided_slice %9 {offsets = [0, 8], sizes = [8, 4], strides = [1, 1]} : vector<8x32xf32> to vector<8x4xf32>
    %47 = vector.extract_strided_slice %10 {offsets = [0, 8], sizes = [8, 4], strides = [1, 1]} : vector<8x32xf32> to vector<8x4xf32>
    %48 = vector.extract_strided_slice %11 {offsets = [0, 8], sizes = [8, 4], strides = [1, 1]} : vector<8x32xf32> to vector<8x4xf32>
    %cst_23 = arith.constant dense<0.000000e+00> : vector<8x8xf32>
    %49 = tpu.matmul %46, %47, %cst_23 {dimension_numbers = #tpu.dot_dimension_numbers<[1], [1], [0], [0], [0, 0, 1, 0], [], []>} : vector<8x4xf32>, vector<8x4xf32>, vector<8x8xf32> -> vector<8x8xf32>
    %cst_24 = arith.constant 5.000000e-01 : f32
    %50 = vector.broadcast %cst_24 : f32 to vector<8x8xf32>
    %51 = arith.mulf %50, %49 : vector<8x8xf32>
    %cst_25 = arith.constant dense<0xFF800000> : vector<8xf32>
    %52 = vector.multi_reduction <maximumf>, %51, %cst_25 [1] : vector<8x8xf32> to vector<8xf32>
    %53 = vector.shape_cast %52 : vector<8xf32> to vector<8x1xf32>
    %54 = vector.broadcast %53 : vector<8x1xf32> to vector<8x8xf32>
    %55 = arith.subf %51, %54 : vector<8x8xf32>
    %56 = math.exp %55 : vector<8x8xf32>
    %cst_26 = arith.constant dense<0.000000e+00> : vector<8xf32>
    %57 = vector.multi_reduction <add>, %56, %cst_26 [1] : vector<8x8xf32> to vector<8xf32>
    %58 = vector.shape_cast %57 : vector<8xf32> to vector<8x1xf32>
    %59 = tpu.reciprocal %58 : vector<8x1xf32> -> vector<8x1xf32>
    %60 = vector.broadcast %59 : vector<8x1xf32> to vector<8x8xf32>
    %61 = arith.mulf %56, %60 : vector<8x8xf32>
    %cst_27 = arith.constant dense<0.000000e+00> : vector<8x4xf32>
    %62 = tpu.matmul %61, %48, %cst_27 {dimension_numbers = #tpu.dot_dimension_numbers<[1], [0], [0], [1], [0, 0, 1, 1], [], []>} : vector<8x8xf32>, vector<8x4xf32>, vector<8x4xf32> -> vector<8x4xf32>
    %63 = vector.extract_strided_slice %9 {offsets = [0, 12], sizes = [8, 4], strides = [1, 1]} : vector<8x32xf32> to vector<8x4xf32>
    %64 = vector.extract_strided_slice %10 {offsets = [0, 12], sizes = [8, 4], strides = [1, 1]} : vector<8x32xf32> to vector<8x4xf32>
    %65 = vector.extract_strided_slice %11 {offsets = [0, 12], sizes = [8, 4], strides = [1, 1]} : vector<8x32xf32> to vector<8x4xf32>
    %cst_28 = arith.constant dense<0.000000e+00> : vector<8x8xf32>
    %66 = tpu.matmul %63, %64, %cst_28 {dimension_numbers = #tpu.dot_dimension_numbers<[1], [1], [0], [0], [0, 0, 1, 0], [], []>} : vector<8x4xf32>, vector<8x4xf32>, vector<8x8xf32> -> vector<8x8xf32>
    %cst_29 = arith.constant 5.000000e-01 : f32
    %67 = vector.broadcast %cst_29 : f32 to vector<8x8xf32>
    %68 = arith.mulf %67, %66 : vector<8x8xf32>
    %cst_30 = arith.constant dense<0xFF800000> : vector<8xf32>
    %69 = vector.multi_reduction <maximumf>, %68, %cst_30 [1] : vector<8x8xf32> to vector<8xf32>
    %70 = vector.shape_cast %69 : vector<8xf32> to vector<8x1xf32>
    %71 = vector.broadcast %70 : vector<8x1xf32> to vector<8x8xf32>
    %72 = arith.subf %68, %71 : vector<8x8xf32>
    %73 = math.exp %72 : vector<8x8xf32>
    %cst_31 = arith.constant dense<0.000000e+00> : vector<8xf32>
    %74 = vector.multi_reduction <add>, %73, %cst_31 [1] : vector<8x8xf32> to vector<8xf32>
    %75 = vector.shape_cast %74 : vector<8xf32> to vector<8x1xf32>
    %76 = tpu.reciprocal %75 : vector<8x1xf32> -> vector<8x1xf32>
    %77 = vector.broadcast %76 : vector<8x1xf32> to vector<8x8xf32>
    %78 = arith.mulf %73, %77 : vector<8x8xf32>
    %cst_32 = arith.constant dense<0.000000e+00> : vector<8x4xf32>
    %79 = tpu.matmul %78, %65, %cst_32 {dimension_numbers = #tpu.dot_dimension_numbers<[1], [0], [0], [1], [0, 0, 1, 1], [], []>} : vector<8x8xf32>, vector<8x4xf32>, vector<8x4xf32> -> vector<8x4xf32>
    %80 = vector.extract_strided_slice %9 {offsets = [0, 16], sizes = [8, 4], strides = [1, 1]} : vector<8x32xf32> to vector<8x4xf32>
    %81 = vector.extract_strided_slice %10 {offsets = [0, 16], sizes = [8, 4], strides = [1, 1]} : vector<8x32xf32> to vector<8x4xf32>
    %82 = vector.extract_strided_slice %11 {offsets = [0, 16], sizes = [8, 4], strides = [1, 1]} : vector<8x32xf32> to vector<8x4xf32>
    %cst_33 = arith.constant dense<0.000000e+00> : vector<8x8xf32>
    %83 = tpu.matmul %80, %81, %cst_33 {dimension_numbers = #tpu.dot_dimension_numbers<[1], [1], [0], [0], [0, 0, 1, 0], [], []>} : vector<8x4xf32>, vector<8x4xf32>, vector<8x8xf32> -> vector<8x8xf32>
    %cst_34 = arith.constant 5.000000e-01 : f32
    %84 = vector.broadcast %cst_34 : f32 to vector<8x8xf32>
    %85 = arith.mulf %84, %83 : vector<8x8xf32>
    %cst_35 = arith.constant dense<0xFF800000> : vector<8xf32>
    %86 = vector.multi_reduction <maximumf>, %85, %cst_35 [1] : vector<8x8xf32> to vector<8xf32>
    %87 = vector.shape_cast %86 : vector<8xf32> to vector<8x1xf32>
    %88 = vector.broadcast %87 : vector<8x1xf32> to vector<8x8xf32>
    %89 = arith.subf %85, %88 : vector<8x8xf32>
    %90 = math.exp %89 : vector<8x8xf32>
    %cst_36 = arith.constant dense<0.000000e+00> : vector<8xf32>
    %91 = vector.multi_reduction <add>, %90, %cst_36 [1] : vector<8x8xf32> to vector<8xf32>
    %92 = vector.shape_cast %91 : vector<8xf32> to vector<8x1xf32>
    %93 = tpu.reciprocal %92 : vector<8x1xf32> -> vector<8x1xf32>
    %94 = vector.broadcast %93 : vector<8x1xf32> to vector<8x8xf32>
    %95 = arith.mulf %90, %94 : vector<8x8xf32>
    %cst_37 = arith.constant dense<0.000000e+00> : vector<8x4xf32>
    %96 = tpu.matmul %95, %82, %cst_37 {dimension_numbers = #tpu.dot_dimension_numbers<[1], [0], [0], [1], [0, 0, 1, 1], [], []>} : vector<8x8xf32>, vector<8x4xf32>, vector<8x4xf32> -> vector<8x4xf32>
    %97 = vector.extract_strided_slice %9 {offsets = [0, 20], sizes = [8, 4], strides = [1, 1]} : vector<8x32xf32> to vector<8x4xf32>
    %98 = vector.extract_strided_slice %10 {offsets = [0, 20], sizes = [8, 4], strides = [1, 1]} : vector<8x32xf32> to vector<8x4xf32>
    %99 = vector.extract_strided_slice %11 {offsets = [0, 20], sizes = [8, 4], strides = [1, 1]} : vector<8x32xf32> to vector<8x4xf32>
    %cst_38 = arith.constant dense<0.000000e+00> : vector<8x8xf32>
    %100 = tpu.matmul %97, %98, %cst_38 {dimension_numbers = #tpu.dot_dimension_numbers<[1], [1], [0], [0], [0, 0, 1, 0], [], []>} : vector<8x4xf32>, vector<8x4xf32>, vector<8x8xf32> -> vector<8x8xf32>
    %cst_39 = arith.constant 5.000000e-01 : f32
    %101 = vector.broadcast %cst_39 : f32 to vector<8x8xf32>
    %102 = arith.mulf %101, %100 : vector<8x8xf32>
    %cst_40 = arith.constant dense<0xFF800000> : vector<8xf32>
    %103 = vector.multi_reduction <maximumf>, %102, %cst_40 [1] : vector<8x8xf32> to vector<8xf32>
    %104 = vector.shape_cast %103 : vector<8xf32> to vector<8x1xf32>
    %105 = vector.broadcast %104 : vector<8x1xf32> to vector<8x8xf32>
    %106 = arith.subf %102, %105 : vector<8x8xf32>
    %107 = math.exp %106 : vector<8x8xf32>
    %cst_41 = arith.constant dense<0.000000e+00> : vector<8xf32>
    %108 = vector.multi_reduction <add>, %107, %cst_41 [1] : vector<8x8xf32> to vector<8xf32>
    %109 = vector.shape_cast %108 : vector<8xf32> to vector<8x1xf32>
    %110 = tpu.reciprocal %109 : vector<8x1xf32> -> vector<8x1xf32>
    %111 = vector.broadcast %110 : vector<8x1xf32> to vector<8x8xf32>
    %112 = arith.mulf %107, %111 : vector<8x8xf32>
    %cst_42 = arith.constant dense<0.000000e+00> : vector<8x4xf32>
    %113 = tpu.matmul %112, %99, %cst_42 {dimension_numbers = #tpu.dot_dimension_numbers<[1], [0], [0], [1], [0, 0, 1, 1], [], []>} : vector<8x8xf32>, vector<8x4xf32>, vector<8x4xf32> -> vector<8x4xf32>
    %114 = vector.extract_strided_slice %9 {offsets = [0, 24], sizes = [8, 4], strides = [1, 1]} : vector<8x32xf32> to vector<8x4xf32>
    %115 = vector.extract_strided_slice %10 {offsets = [0, 24], sizes = [8, 4], strides = [1, 1]} : vector<8x32xf32> to vector<8x4xf32>
    %116 = vector.extract_strided_slice %11 {offsets = [0, 24], sizes = [8, 4], strides = [1, 1]} : vector<8x32xf32> to vector<8x4xf32>
    %cst_43 = arith.constant dense<0.000000e+00> : vector<8x8xf32>
    %117 = tpu.matmul %114, %115, %cst_43 {dimension_numbers = #tpu.dot_dimension_numbers<[1], [1], [0], [0], [0, 0, 1, 0], [], []>} : vector<8x4xf32>, vector<8x4xf32>, vector<8x8xf32> -> vector<8x8xf32>
    %cst_44 = arith.constant 5.000000e-01 : f32
    %118 = vector.broadcast %cst_44 : f32 to vector<8x8xf32>
    %119 = arith.mulf %118, %117 : vector<8x8xf32>
    %cst_45 = arith.constant dense<0xFF800000> : vector<8xf32>
    %120 = vector.multi_reduction <maximumf>, %119, %cst_45 [1] : vector<8x8xf32> to vector<8xf32>
    %121 = vector.shape_cast %120 : vector<8xf32> to vector<8x1xf32>
    %122 = vector.broadcast %121 : vector<8x1xf32> to vector<8x8xf32>
    %123 = arith.subf %119, %122 : vector<8x8xf32>
    %124 = math.exp %123 : vector<8x8xf32>
    %cst_46 = arith.constant dense<0.000000e+00> : vector<8xf32>
    %125 = vector.multi_reduction <add>, %124, %cst_46 [1] : vector<8x8xf32> to vector<8xf32>
    %126 = vector.shape_cast %125 : vector<8xf32> to vector<8x1xf32>
    %127 = tpu.reciprocal %126 : vector<8x1xf32> -> vector<8x1xf32>
    %128 = vector.broadcast %127 : vector<8x1xf32> to vector<8x8xf32>
    %129 = arith.mulf %124, %128 : vector<8x8xf32>
    %cst_47 = arith.constant dense<0.000000e+00> : vector<8x4xf32>
    %130 = tpu.matmul %129, %116, %cst_47 {dimension_numbers = #tpu.dot_dimension_numbers<[1], [0], [0], [1], [0, 0, 1, 1], [], []>} : vector<8x8xf32>, vector<8x4xf32>, vector<8x4xf32> -> vector<8x4xf32>
    %131 = vector.extract_strided_slice %9 {offsets = [0, 28], sizes = [8, 4], strides = [1, 1]} : vector<8x32xf32> to vector<8x4xf32>
    %132 = vector.extract_strided_slice %10 {offsets = [0, 28], sizes = [8, 4], strides = [1, 1]} : vector<8x32xf32> to vector<8x4xf32>
    %133 = vector.extract_strided_slice %11 {offsets = [0, 28], sizes = [8, 4], strides = [1, 1]} : vector<8x32xf32> to vector<8x4xf32>
    %cst_48 = arith.constant dense<0.000000e+00> : vector<8x8xf32>
    %134 = tpu.matmul %131, %132, %cst_48 {dimension_numbers = #tpu.dot_dimension_numbers<[1], [1], [0], [0], [0, 0, 1, 0], [], []>} : vector<8x4xf32>, vector<8x4xf32>, vector<8x8xf32> -> vector<8x8xf32>
    %cst_49 = arith.constant 5.000000e-01 : f32
    %135 = vector.broadcast %cst_49 : f32 to vector<8x8xf32>
    %136 = arith.mulf %135, %134 : vector<8x8xf32>
    %cst_50 = arith.constant dense<0xFF800000> : vector<8xf32>
    %137 = vector.multi_reduction <maximumf>, %136, %cst_50 [1] : vector<8x8xf32> to vector<8xf32>
    %138 = vector.shape_cast %137 : vector<8xf32> to vector<8x1xf32>
    %139 = vector.broadcast %138 : vector<8x1xf32> to vector<8x8xf32>
    %140 = arith.subf %136, %139 : vector<8x8xf32>
    %141 = math.exp %140 : vector<8x8xf32>
    %cst_51 = arith.constant dense<0.000000e+00> : vector<8xf32>
    %142 = vector.multi_reduction <add>, %141, %cst_51 [1] : vector<8x8xf32> to vector<8xf32>
    %143 = vector.shape_cast %142 : vector<8xf32> to vector<8x1xf32>
    %144 = tpu.reciprocal %143 : vector<8x1xf32> -> vector<8x1xf32>
    %145 = vector.broadcast %144 : vector<8x1xf32> to vector<8x8xf32>
    %146 = arith.mulf %141, %145 : vector<8x8xf32>
    %cst_52 = arith.constant dense<0.000000e+00> : vector<8x4xf32>
    %147 = tpu.matmul %146, %133, %cst_52 {dimension_numbers = #tpu.dot_dimension_numbers<[1], [0], [0], [1], [0, 0, 1, 1], [], []>} : vector<8x8xf32>, vector<8x4xf32>, vector<8x4xf32> -> vector<8x4xf32>
    %148 = tpu.concatenate %28, %45, %62, %79, %96, %113, %130, %147 in 1 : vector<8x4xf32>, vector<8x4xf32>, vector<8x4xf32>, vector<8x4xf32>, vector<8x4xf32>, vector<8x4xf32>, vector<8x4xf32>, vector<8x4xf32> -> vector<8x32xf32>
    %149 = vector.extract_strided_slice %2 {offsets = [8, 0], sizes = [8, 32], strides = [1, 1]} : vector<16x32xf32> to vector<8x32xf32>
    %150 = vector.extract_strided_slice %5 {offsets = [8, 0], sizes = [8, 32], strides = [1, 1]} : vector<16x32xf32> to vector<8x32xf32>
    %151 = vector.extract_strided_slice %8 {offsets = [8, 0], sizes = [8, 32], strides = [1, 1]} : vector<16x32xf32> to vector<8x32xf32>
    %152 = vector.extract_strided_slice %149 {offsets = [0, 0], sizes = [8, 4], strides = [1, 1]} : vector<8x32xf32> to vector<8x4xf32>
    %153 = vector.extract_strided_slice %150 {offsets = [0, 0], sizes = [8, 4], strides = [1, 1]} : vector<8x32xf32> to vector<8x4xf32>
    %154 = vector.extract_strided_slice %151 {offsets = [0, 0], sizes = [8, 4], strides = [1, 1]} : vector<8x32xf32> to vector<8x4xf32>
    %cst_53 = arith.constant dense<0.000000e+00> : vector<8x8xf32>
    %155 = tpu.matmul %152, %153, %cst_53 {dimension_numbers = #tpu.dot_dimension_numbers<[1], [1], [0], [0], [0, 0, 1, 0], [], []>} : vector<8x4xf32>, vector<8x4xf32>, vector<8x8xf32> -> vector<8x8xf32>
    %cst_54 = arith.constant 5.000000e-01 : f32
    %156 = vector.broadcast %cst_54 : f32 to vector<8x8xf32>
    %157 = arith.mulf %156, %155 : vector<8x8xf32>
    %cst_55 = arith.constant dense<0xFF800000> : vector<8xf32>
    %158 = vector.multi_reduction <maximumf>, %157, %cst_55 [1] : vector<8x8xf32> to vector<8xf32>
    %159 = vector.shape_cast %158 : vector<8xf32> to vector<8x1xf32>
    %160 = vector.broadcast %159 : vector<8x1xf32> to vector<8x8xf32>
    %161 = arith.subf %157, %160 : vector<8x8xf32>
    %162 = math.exp %161 : vector<8x8xf32>
    %cst_56 = arith.constant dense<0.000000e+00> : vector<8xf32>
    %163 = vector.multi_reduction <add>, %162, %cst_56 [1] : vector<8x8xf32> to vector<8xf32>
    %164 = vector.shape_cast %163 : vector<8xf32> to vector<8x1xf32>
    %165 = tpu.reciprocal %164 : vector<8x1xf32> -> vector<8x1xf32>
    %166 = vector.broadcast %165 : vector<8x1xf32> to vector<8x8xf32>
    %167 = arith.mulf %162, %166 : vector<8x8xf32>
    %cst_57 = arith.constant dense<0.000000e+00> : vector<8x4xf32>
    %168 = tpu.matmul %167, %154, %cst_57 {dimension_numbers = #tpu.dot_dimension_numbers<[1], [0], [0], [1], [0, 0, 1, 1], [], []>} : vector<8x8xf32>, vector<8x4xf32>, vector<8x4xf32> -> vector<8x4xf32>
    %169 = vector.extract_strided_slice %149 {offsets = [0, 4], sizes = [8, 4], strides = [1, 1]} : vector<8x32xf32> to vector<8x4xf32>
    %170 = vector.extract_strided_slice %150 {offsets = [0, 4], sizes = [8, 4], strides = [1, 1]} : vector<8x32xf32> to vector<8x4xf32>
    %171 = vector.extract_strided_slice %151 {offsets = [0, 4], sizes = [8, 4], strides = [1, 1]} : vector<8x32xf32> to vector<8x4xf32>
    %cst_58 = arith.constant dense<0.000000e+00> : vector<8x8xf32>
    %172 = tpu.matmul %169, %170, %cst_58 {dimension_numbers = #tpu.dot_dimension_numbers<[1], [1], [0], [0], [0, 0, 1, 0], [], []>} : vector<8x4xf32>, vector<8x4xf32>, vector<8x8xf32> -> vector<8x8xf32>
    %cst_59 = arith.constant 5.000000e-01 : f32
    %173 = vector.broadcast %cst_59 : f32 to vector<8x8xf32>
    %174 = arith.mulf %173, %172 : vector<8x8xf32>
    %cst_60 = arith.constant dense<0xFF800000> : vector<8xf32>
    %175 = vector.multi_reduction <maximumf>, %174, %cst_60 [1] : vector<8x8xf32> to vector<8xf32>
    %176 = vector.shape_cast %175 : vector<8xf32> to vector<8x1xf32>
    %177 = vector.broadcast %176 : vector<8x1xf32> to vector<8x8xf32>
    %178 = arith.subf %174, %177 : vector<8x8xf32>
    %179 = math.exp %178 : vector<8x8xf32>
    %cst_61 = arith.constant dense<0.000000e+00> : vector<8xf32>
    %180 = vector.multi_reduction <add>, %179, %cst_61 [1] : vector<8x8xf32> to vector<8xf32>
    %181 = vector.shape_cast %180 : vector<8xf32> to vector<8x1xf32>
    %182 = tpu.reciprocal %181 : vector<8x1xf32> -> vector<8x1xf32>
    %183 = vector.broadcast %182 : vector<8x1xf32> to vector<8x8xf32>
    %184 = arith.mulf %179, %183 : vector<8x8xf32>
    %cst_62 = arith.constant dense<0.000000e+00> : vector<8x4xf32>
    %185 = tpu.matmul %184, %171, %cst_62 {dimension_numbers = #tpu.dot_dimension_numbers<[1], [0], [0], [1], [0, 0, 1, 1], [], []>} : vector<8x8xf32>, vector<8x4xf32>, vector<8x4xf32> -> vector<8x4xf32>
    %186 = vector.extract_strided_slice %149 {offsets = [0, 8], sizes = [8, 4], strides = [1, 1]} : vector<8x32xf32> to vector<8x4xf32>
    %187 = vector.extract_strided_slice %150 {offsets = [0, 8], sizes = [8, 4], strides = [1, 1]} : vector<8x32xf32> to vector<8x4xf32>
    %188 = vector.extract_strided_slice %151 {offsets = [0, 8], sizes = [8, 4], strides = [1, 1]} : vector<8x32xf32> to vector<8x4xf32>
    %cst_63 = arith.constant dense<0.000000e+00> : vector<8x8xf32>
    %189 = tpu.matmul %186, %187, %cst_63 {dimension_numbers = #tpu.dot_dimension_numbers<[1], [1], [0], [0], [0, 0, 1, 0], [], []>} : vector<8x4xf32>, vector<8x4xf32>, vector<8x8xf32> -> vector<8x8xf32>
    %cst_64 = arith.constant 5.000000e-01 : f32
    %190 = vector.broadcast %cst_64 : f32 to vector<8x8xf32>
    %191 = arith.mulf %190, %189 : vector<8x8xf32>
    %cst_65 = arith.constant dense<0xFF800000> : vector<8xf32>
    %192 = vector.multi_reduction <maximumf>, %191, %cst_65 [1] : vector<8x8xf32> to vector<8xf32>
    %193 = vector.shape_cast %192 : vector<8xf32> to vector<8x1xf32>
    %194 = vector.broadcast %193 : vector<8x1xf32> to vector<8x8xf32>
    %195 = arith.subf %191, %194 : vector<8x8xf32>
    %196 = math.exp %195 : vector<8x8xf32>
    %cst_66 = arith.constant dense<0.000000e+00> : vector<8xf32>
    %197 = vector.multi_reduction <add>, %196, %cst_66 [1] : vector<8x8xf32> to vector<8xf32>
    %198 = vector.shape_cast %197 : vector<8xf32> to vector<8x1xf32>
    %199 = tpu.reciprocal %198 : vector<8x1xf32> -> vector<8x1xf32>
    %200 = vector.broadcast %199 : vector<8x1xf32> to vector<8x8xf32>
    %201 = arith.mulf %196, %200 : vector<8x8xf32>
    %cst_67 = arith.constant dense<0.000000e+00> : vector<8x4xf32>
    %202 = tpu.matmul %201, %188, %cst_67 {dimension_numbers = #tpu.dot_dimension_numbers<[1], [0], [0], [1], [0, 0, 1, 1], [], []>} : vector<8x8xf32>, vector<8x4xf32>, vector<8x4xf32> -> vector<8x4xf32>
    %203 = vector.extract_strided_slice %149 {offsets = [0, 12], sizes = [8, 4], strides = [1, 1]} : vector<8x32xf32> to vector<8x4xf32>
    %204 = vector.extract_strided_slice %150 {offsets = [0, 12], sizes = [8, 4], strides = [1, 1]} : vector<8x32xf32> to vector<8x4xf32>
    %205 = vector.extract_strided_slice %151 {offsets = [0, 12], sizes = [8, 4], strides = [1, 1]} : vector<8x32xf32> to vector<8x4xf32>
    %cst_68 = arith.constant dense<0.000000e+00> : vector<8x8xf32>
    %206 = tpu.matmul %203, %204, %cst_68 {dimension_numbers = #tpu.dot_dimension_numbers<[1], [1], [0], [0], [0, 0, 1, 0], [], []>} : vector<8x4xf32>, vector<8x4xf32>, vector<8x8xf32> -> vector<8x8xf32>
    %cst_69 = arith.constant 5.000000e-01 : f32
    %207 = vector.broadcast %cst_69 : f32 to vector<8x8xf32>
    %208 = arith.mulf %207, %206 : vector<8x8xf32>
    %cst_70 = arith.constant dense<0xFF800000> : vector<8xf32>
    %209 = vector.multi_reduction <maximumf>, %208, %cst_70 [1] : vector<8x8xf32> to vector<8xf32>
    %210 = vector.shape_cast %209 : vector<8xf32> to vector<8x1xf32>
    %211 = vector.broadcast %210 : vector<8x1xf32> to vector<8x8xf32>
    %212 = arith.subf %208, %211 : vector<8x8xf32>
    %213 = math.exp %212 : vector<8x8xf32>
    %cst_71 = arith.constant dense<0.000000e+00> : vector<8xf32>
    %214 = vector.multi_reduction <add>, %213, %cst_71 [1] : vector<8x8xf32> to vector<8xf32>
    %215 = vector.shape_cast %214 : vector<8xf32> to vector<8x1xf32>
    %216 = tpu.reciprocal %215 : vector<8x1xf32> -> vector<8x1xf32>
    %217 = vector.broadcast %216 : vector<8x1xf32> to vector<8x8xf32>
    %218 = arith.mulf %213, %217 : vector<8x8xf32>
    %cst_72 = arith.constant dense<0.000000e+00> : vector<8x4xf32>
    %219 = tpu.matmul %218, %205, %cst_72 {dimension_numbers = #tpu.dot_dimension_numbers<[1], [0], [0], [1], [0, 0, 1, 1], [], []>} : vector<8x8xf32>, vector<8x4xf32>, vector<8x4xf32> -> vector<8x4xf32>
    %220 = vector.extract_strided_slice %149 {offsets = [0, 16], sizes = [8, 4], strides = [1, 1]} : vector<8x32xf32> to vector<8x4xf32>
    %221 = vector.extract_strided_slice %150 {offsets = [0, 16], sizes = [8, 4], strides = [1, 1]} : vector<8x32xf32> to vector<8x4xf32>
    %222 = vector.extract_strided_slice %151 {offsets = [0, 16], sizes = [8, 4], strides = [1, 1]} : vector<8x32xf32> to vector<8x4xf32>
    %cst_73 = arith.constant dense<0.000000e+00> : vector<8x8xf32>
    %223 = tpu.matmul %220, %221, %cst_73 {dimension_numbers = #tpu.dot_dimension_numbers<[1], [1], [0], [0], [0, 0, 1, 0], [], []>} : vector<8x4xf32>, vector<8x4xf32>, vector<8x8xf32> -> vector<8x8xf32>
    %cst_74 = arith.constant 5.000000e-01 : f32
    %224 = vector.broadcast %cst_74 : f32 to vector<8x8xf32>
    %225 = arith.mulf %224, %223 : vector<8x8xf32>
    %cst_75 = arith.constant dense<0xFF800000> : vector<8xf32>
    %226 = vector.multi_reduction <maximumf>, %225, %cst_75 [1] : vector<8x8xf32> to vector<8xf32>
    %227 = vector.shape_cast %226 : vector<8xf32> to vector<8x1xf32>
    %228 = vector.broadcast %227 : vector<8x1xf32> to vector<8x8xf32>
    %229 = arith.subf %225, %228 : vector<8x8xf32>
    %230 = math.exp %229 : vector<8x8xf32>
    %cst_76 = arith.constant dense<0.000000e+00> : vector<8xf32>
    %231 = vector.multi_reduction <add>, %230, %cst_76 [1] : vector<8x8xf32> to vector<8xf32>
    %232 = vector.shape_cast %231 : vector<8xf32> to vector<8x1xf32>
    %233 = tpu.reciprocal %232 : vector<8x1xf32> -> vector<8x1xf32>
    %234 = vector.broadcast %233 : vector<8x1xf32> to vector<8x8xf32>
    %235 = arith.mulf %230, %234 : vector<8x8xf32>
    %cst_77 = arith.constant dense<0.000000e+00> : vector<8x4xf32>
    %236 = tpu.matmul %235, %222, %cst_77 {dimension_numbers = #tpu.dot_dimension_numbers<[1], [0], [0], [1], [0, 0, 1, 1], [], []>} : vector<8x8xf32>, vector<8x4xf32>, vector<8x4xf32> -> vector<8x4xf32>
    %237 = vector.extract_strided_slice %149 {offsets = [0, 20], sizes = [8, 4], strides = [1, 1]} : vector<8x32xf32> to vector<8x4xf32>
    %238 = vector.extract_strided_slice %150 {offsets = [0, 20], sizes = [8, 4], strides = [1, 1]} : vector<8x32xf32> to vector<8x4xf32>
    %239 = vector.extract_strided_slice %151 {offsets = [0, 20], sizes = [8, 4], strides = [1, 1]} : vector<8x32xf32> to vector<8x4xf32>
    %cst_78 = arith.constant dense<0.000000e+00> : vector<8x8xf32>
    %240 = tpu.matmul %237, %238, %cst_78 {dimension_numbers = #tpu.dot_dimension_numbers<[1], [1], [0], [0], [0, 0, 1, 0], [], []>} : vector<8x4xf32>, vector<8x4xf32>, vector<8x8xf32> -> vector<8x8xf32>
    %cst_79 = arith.constant 5.000000e-01 : f32
    %241 = vector.broadcast %cst_79 : f32 to vector<8x8xf32>
    %242 = arith.mulf %241, %240 : vector<8x8xf32>
    %cst_80 = arith.constant dense<0xFF800000> : vector<8xf32>
    %243 = vector.multi_reduction <maximumf>, %242, %cst_80 [1] : vector<8x8xf32> to vector<8xf32>
    %244 = vector.shape_cast %243 : vector<8xf32> to vector<8x1xf32>
    %245 = vector.broadcast %244 : vector<8x1xf32> to vector<8x8xf32>
    %246 = arith.subf %242, %245 : vector<8x8xf32>
    %247 = math.exp %246 : vector<8x8xf32>
    %cst_81 = arith.constant dense<0.000000e+00> : vector<8xf32>
    %248 = vector.multi_reduction <add>, %247, %cst_81 [1] : vector<8x8xf32> to vector<8xf32>
    %249 = vector.shape_cast %248 : vector<8xf32> to vector<8x1xf32>
    %250 = tpu.reciprocal %249 : vector<8x1xf32> -> vector<8x1xf32>
    %251 = vector.broadcast %250 : vector<8x1xf32> to vector<8x8xf32>
    %252 = arith.mulf %247, %251 : vector<8x8xf32>
    %cst_82 = arith.constant dense<0.000000e+00> : vector<8x4xf32>
    %253 = tpu.matmul %252, %239, %cst_82 {dimension_numbers = #tpu.dot_dimension_numbers<[1], [0], [0], [1], [0, 0, 1, 1], [], []>} : vector<8x8xf32>, vector<8x4xf32>, vector<8x4xf32> -> vector<8x4xf32>
    %254 = vector.extract_strided_slice %149 {offsets = [0, 24], sizes = [8, 4], strides = [1, 1]} : vector<8x32xf32> to vector<8x4xf32>
    %255 = vector.extract_strided_slice %150 {offsets = [0, 24], sizes = [8, 4], strides = [1, 1]} : vector<8x32xf32> to vector<8x4xf32>
    %256 = vector.extract_strided_slice %151 {offsets = [0, 24], sizes = [8, 4], strides = [1, 1]} : vector<8x32xf32> to vector<8x4xf32>
    %cst_83 = arith.constant dense<0.000000e+00> : vector<8x8xf32>
    %257 = tpu.matmul %254, %255, %cst_83 {dimension_numbers = #tpu.dot_dimension_numbers<[1], [1], [0], [0], [0, 0, 1, 0], [], []>} : vector<8x4xf32>, vector<8x4xf32>, vector<8x8xf32> -> vector<8x8xf32>
    %cst_84 = arith.constant 5.000000e-01 : f32
    %258 = vector.broadcast %cst_84 : f32 to vector<8x8xf32>
    %259 = arith.mulf %258, %257 : vector<8x8xf32>
    %cst_85 = arith.constant dense<0xFF800000> : vector<8xf32>
    %260 = vector.multi_reduction <maximumf>, %259, %cst_85 [1] : vector<8x8xf32> to vector<8xf32>
    %261 = vector.shape_cast %260 : vector<8xf32> to vector<8x1xf32>
    %262 = vector.broadcast %261 : vector<8x1xf32> to vector<8x8xf32>
    %263 = arith.subf %259, %262 : vector<8x8xf32>
    %264 = math.exp %263 : vector<8x8xf32>
    %cst_86 = arith.constant dense<0.000000e+00> : vector<8xf32>
    %265 = vector.multi_reduction <add>, %264, %cst_86 [1] : vector<8x8xf32> to vector<8xf32>
    %266 = vector.shape_cast %265 : vector<8xf32> to vector<8x1xf32>
    %267 = tpu.reciprocal %266 : vector<8x1xf32> -> vector<8x1xf32>
    %268 = vector.broadcast %267 : vector<8x1xf32> to vector<8x8xf32>
    %269 = arith.mulf %264, %268 : vector<8x8xf32>
    %cst_87 = arith.constant dense<0.000000e+00> : vector<8x4xf32>
    %270 = tpu.matmul %269, %256, %cst_87 {dimension_numbers = #tpu.dot_dimension_numbers<[1], [0], [0], [1], [0, 0, 1, 1], [], []>} : vector<8x8xf32>, vector<8x4xf32>, vector<8x4xf32> -> vector<8x4xf32>
    %271 = vector.extract_strided_slice %149 {offsets = [0, 28], sizes = [8, 4], strides = [1, 1]} : vector<8x32xf32> to vector<8x4xf32>
    %272 = vector.extract_strided_slice %150 {offsets = [0, 28], sizes = [8, 4], strides = [1, 1]} : vector<8x32xf32> to vector<8x4xf32>
    %273 = vector.extract_strided_slice %151 {offsets = [0, 28], sizes = [8, 4], strides = [1, 1]} : vector<8x32xf32> to vector<8x4xf32>
    %cst_88 = arith.constant dense<0.000000e+00> : vector<8x8xf32>
    %274 = tpu.matmul %271, %272, %cst_88 {dimension_numbers = #tpu.dot_dimension_numbers<[1], [1], [0], [0], [0, 0, 1, 0], [], []>} : vector<8x4xf32>, vector<8x4xf32>, vector<8x8xf32> -> vector<8x8xf32>
    %cst_89 = arith.constant 5.000000e-01 : f32
    %275 = vector.broadcast %cst_89 : f32 to vector<8x8xf32>
    %276 = arith.mulf %275, %274 : vector<8x8xf32>
    %cst_90 = arith.constant dense<0xFF800000> : vector<8xf32>
    %277 = vector.multi_reduction <maximumf>, %276, %cst_90 [1] : vector<8x8xf32> to vector<8xf32>
    %278 = vector.shape_cast %277 : vector<8xf32> to vector<8x1xf32>
    %279 = vector.broadcast %278 : vector<8x1xf32> to vector<8x8xf32>
    %280 = arith.subf %276, %279 : vector<8x8xf32>
    %281 = math.exp %280 : vector<8x8xf32>
    %cst_91 = arith.constant dense<0.000000e+00> : vector<8xf32>
    %282 = vector.multi_reduction <add>, %281, %cst_91 [1] : vector<8x8xf32> to vector<8xf32>
    %283 = vector.shape_cast %282 : vector<8xf32> to vector<8x1xf32>
    %284 = tpu.reciprocal %283 : vector<8x1xf32> -> vector<8x1xf32>
    %285 = vector.broadcast %284 : vector<8x1xf32> to vector<8x8xf32>
    %286 = arith.mulf %281, %285 : vector<8x8xf32>
    %cst_92 = arith.constant dense<0.000000e+00> : vector<8x4xf32>
    %287 = tpu.matmul %286, %273, %cst_92 {dimension_numbers = #tpu.dot_dimension_numbers<[1], [0], [0], [1], [0, 0, 1, 1], [], []>} : vector<8x8xf32>, vector<8x4xf32>, vector<8x4xf32> -> vector<8x4xf32>
    %288 = tpu.concatenate %168, %185, %202, %219, %236, %253, %270, %287 in 1 : vector<8x4xf32>, vector<8x4xf32>, vector<8x4xf32>, vector<8x4xf32>, vector<8x4xf32>, vector<8x4xf32>, vector<8x4xf32>, vector<8x4xf32> -> vector<8x32xf32>
    %289 = tpu.concatenate %148, %288 in 0 : vector<8x32xf32>, vector<8x32xf32> -> vector<16x32xf32>
    %c0_93 = arith.constant 0 : index
    %c0_94 = arith.constant 0 : index
    %290 = vector.load %arg6[%c0_93, %c0_94] : memref<32x32xf32, #tpu.memory_space<vmem>>, vector<32x32xf32>
    %cst_95 = arith.constant dense<0.000000e+00> : vector<16x32xf32>
    %291 = tpu.matmul %289, %290, %cst_95 {dimension_numbers = #tpu.dot_dimension_numbers<[1], [0], [0], [1], [0, 0, 1, 1], [], []>} : vector<16x32xf32>, vector<32x32xf32>, vector<16x32xf32> -> vector<16x32xf32>
    %c0_96 = arith.constant 0 : index
    %c0_97 = arith.constant 0 : index
    %292 = vector.load %arg7[%c0_96, %c0_97] : memref<16x32xf32, #tpu.memory_space<vmem>>, vector<16x32xf32>
    tpu.vector_store %arg7[%c0_96, %c0_97], %291 {strides = array<i32>} : memref<16x32xf32, #tpu.memory_space<vmem>>, vector<16x32xf32>,
    return
  }
  func.func @transform_0(%arg0: i32) -> (i32, i32) {
    %c0_i32 = arith.constant 0 : i32
    %c0_i32_0 = arith.constant 0 : i32
    return %arg0, %c0_i32 : i32, i32
  }
  func.func @transform_1(%arg0: i32) -> (i32, i32) {
    %c0_i32 = arith.constant 0 : i32
    %c0_i32_0 = arith.constant 0 : i32
    return %arg0, %c0_i32 : i32, i32
  }
  func.func @transform_2(%arg0: i32) -> (i32, i32) {
    %c0_i32 = arith.constant 0 : i32
    %c0_i32_0 = arith.constant 0 : i32
    %c0_i32_1 = arith.constant 0 : i32
    return %c0_i32, %c0_i32_0 : i32, i32
  }
  func.func @transform_3(%arg0: i32) -> (i32, i32) {
    %c0_i32 = arith.constant 0 : i32
    %c0_i32_0 = arith.constant 0 : i32
    %c0_i32_1 = arith.constant 0 : i32
    return %c0_i32, %c0_i32_0 : i32, i32
  }
  func.func @transform_4(%arg0: i32) -> (i32, i32) {
    %c0_i32 = arith.constant 0 : i32
    %c0_i32_0 = arith.constant 0 : i32
    %c0_i32_1 = arith.constant 0 : i32
    return %c0_i32, %c0_i32_0 : i32, i32
  }
  func.func @transform_5(%arg0: i32) -> (i32, i32) {
    %c0_i32 = arith.constant 0 : i32
    %c0_i32_0 = arith.constant 0 : i32
    %c0_i32_1 = arith.constant 0 : i32
    return %c0_i32, %c0_i32_0 : i32, i32
  }
  func.func @transform_6(%arg0: i32) -> (i32, i32) {
    %c0_i32 = arith.constant 0 : i32
    %c0_i32_0 = arith.constant 0 : i32
    return %arg0, %c0_i32 : i32, i32
  }
}

</mosaic_0001>

<bundles_post_ra>
// kernel: tpu_custom_call.1
= control target key start
LH: loop header
LB: loop body
LE: loop exit
PB: predicated region body
PF: predicated region fallthrough
CT: control target
= control target key end

     0   :  { %11 = vsyncpa [#allocation3], 0  ;;  %s4428_s0 = inlined_call_operand.hbm [shape: f32[16,32], index: 0, kind: input, shape index: {}]   ;;  %s4429_s1 = inlined_call_operand.hbm [shape: f32[16,32], index: 1, kind: input, shape index: {}]   ;;  %s4430_s2 = inlined_call_operand.hbm [shape: f32[32,32], index: 2, kind: input, shape index: {}]   ;;  %s4431_s3 = inlined_call_operand.hbm [shape: f32[32,32], index: 3, kind: input, shape index: {}]   ;;  %s4432_s4 = inlined_call_operand.hbm [shape: f32[32,32], index: 4, kind: input, shape index: {}]   ;;  %s4433_s5 = inlined_call_operand.hbm [shape: f32[32,32], index: 5, kind: input, shape index: {}]   ;;  %s4434_s6 = inlined_call_operand.hbm [shape: f32[16,32], index: 6, kind: output, shape index: {}]  }
   0x1   :  { %12 = vsyncpa [#allocation6], 0 }
   0x2   :  { %13 = vsyncpa [#allocation9], 0 }
   0x3   :  { %14 = vsyncpa [#allocation12], 0 }
   0x4   :  { %15 = vsyncpa [#allocation4], 0  ;;  %s3824_s21 = smov [#allocation5]   ;;  %s3825_s23 = smov [#allocation8]  }
   0x5   :  { %s33_s22 = sshll.u32 %s3824_s21, 4  ;;  %s57_s24 = sshll.u32 %s3825_s23, 4  ;;  %s34_s22 = int_to_ptr.vmem [resolvable:$true] %s33_s22  ;;  %s3883_s24 = int_to_ptr.vmem [resolvable:$true] %s57_s24 }
   0x6   :  { %s3660_s27 = scalar_lea.hbm %s4429_s1, 256 }
   0x7   :  { %p3661_p0 = scmp.ne.s32.totalorder %s4429_s1, %s3660_s27  ;;  %p3664_p1 = scmp.lt.u32.totalorder %s3660_s27, %s4429_s1 }
   0x9   :  { %p3666_p2 = pnand %p3664_p1, %p3661_p0 }
   0xb   :  { %3669 = shalt.err (!%p3666_p2)
}
   0xc   :  { %s3670_s8 = scalar_lea.vmem %s34_s22, 256  ;;  %p3675_p4 = scmp.lt.s32.totalorder %s34_s22, %s34_s22 }
   0xd   :  { %p3671_p3 = scmp.ne.s32.totalorder %s34_s22, %s3670_s8  ;;  %p3676_p5 = scmp.lt.s32.totalorder %s3670_s8, %s3670_s8 }
   0xf   :  { %p3677_p6 = por %p3676_p5, %p3675_p4 }
  0x11   :  { %p3678_p7 = pnand %p3677_p6, %p3671_p3 }
  0x13   :  { %3681 = shalt.err (!%p3678_p7)
}
  0x14   :  { %s3826_s9 = smov 128   ;;  %s3827_s10 = smov 8  }
  0x15   :  { %39 = dma.hbm_to_vmem [thread:$0]  %s4429_s1, 256, %s34_s22, [#allocation6], %s3826_s9, %s3826_s9, %s3827_s10  }
  0x16   :  { %s3682_s15 = scalar_lea.hbm %s4431_s3, 512 }
  0x17   :  { %p3683_p8 = scmp.ne.s32.totalorder %s4431_s3, %s3682_s15  ;;  %p3686_p9 = scmp.lt.u32.totalorder %s3682_s15, %s4431_s3 }
  0x19   :  { %p3688_p10 = pnand %p3686_p9, %p3683_p8 }
  0x1b   :  { %3691 = shalt.err (!%p3688_p10)
}
  0x1c   :  { %s3692_s20 = scalar_lea.vmem %s3883_s24, 512  ;;  %p3697_p12 = scmp.lt.s32.totalorder %s3883_s24, %s3883_s24 }
  0x1d   :  { %p3693_p11 = scmp.ne.s32.totalorder %s3883_s24, %s3692_s20  ;;  %p3698_p13 = scmp.lt.s32.totalorder %s3692_s20, %s3692_s20 }
  0x1f   :  { %p3699_p0 = por %p3698_p13, %p3697_p12 }
  0x21   :  { %p3700_p1 = pnand %p3699_p0, %p3693_p11 }
  0x23   :  { %3703 = shalt.err (!%p3700_p1)
}
  0x24   :  { %63 = dma.hbm_to_vmem [thread:$0]  %s4431_s3, 512, %s3883_s24, [#allocation9], %s3826_s9, %s3826_s9, %s3827_s10  }
  0x25   :  { %s3828_s22 = smov [#allocation2]   ;;  %s3829_s25 = smov [#allocation7]  }
  0x26   :  { %s21_s23 = sshll.u32 %s3828_s22, 4  ;;  %s45_s26 = sshll.u32 %s3829_s25, 4  ;;  %s22_s23 = int_to_ptr.vmem [resolvable:$true] %s21_s23  ;;  %s3920_s26 = int_to_ptr.vmem [resolvable:$true] %s45_s26 }
  0x27   :  { %s3704_s29 = scalar_lea.hbm %s4428_s0, 256 }
  0x28   :  { %p3705_p2 = scmp.ne.s32.totalorder %s4428_s0, %s3704_s29  ;;  %p3708_p3 = scmp.lt.u32.totalorder %s3704_s29, %s4428_s0 }
  0x2a   :  { %p3710_p4 = pnand %p3708_p3, %p3705_p2 }
  0x2c   :  { %3713 = shalt.err (!%p3710_p4)
}
  0x2d   :  { %s3714_s3 = scalar_lea.vmem %s22_s23, 256  ;;  %p3719_p6 = scmp.lt.s32.totalorder %s22_s23, %s22_s23 }
  0x2e   :  { %p3715_p5 = scmp.ne.s32.totalorder %s22_s23, %s3714_s3  ;;  %p3720_p7 = scmp.lt.s32.totalorder %s3714_s3, %s3714_s3 }
  0x30   :  { %p3721_p8 = por %p3720_p7, %p3719_p6 }
  0x32   :  { %p3722_p9 = pnand %p3721_p8, %p3715_p5 }
  0x34   :  { %3725 = shalt.err (!%p3722_p9)
}
  0x35   :  { %27 = dma.hbm_to_vmem [thread:$0]  %s4428_s0, 256, %s22_s23, [#allocation3], %s3826_s9, %s3826_s9, %s3827_s10  }
  0x36   :  { %s3726_s15 = scalar_lea.hbm %s4430_s2, 512 }
  0x37   :  { %p3727_p10 = scmp.ne.s32.totalorder %s4430_s2, %s3726_s15  ;;  %p3730_p11 = scmp.lt.u32.totalorder %s3726_s15, %s4430_s2 }
  0x39   :  { %p3732_p12 = pnand %p3730_p11, %p3727_p10 }
  0x3b   :  { %3735 = shalt.err (!%p3732_p12)
}
  0x3c   :  { %s3736_s20 = scalar_lea.vmem %s3920_s26, 512  ;;  %p3741_p0 = scmp.lt.s32.totalorder %s3920_s26, %s3920_s26 }
  0x3d   :  { %p3737_p13 = scmp.ne.s32.totalorder %s3920_s26, %s3736_s20  ;;  %p3742_p1 = scmp.lt.s32.totalorder %s3736_s20, %s3736_s20 }
  0x3f   :  { %p3743_p2 = por %p3742_p1, %p3741_p0 }
  0x41   :  { %p3744_p3 = pnand %p3743_p2, %p3737_p13 }
  0x43   :  { %3747 = shalt.err (!%p3744_p3)
}
  0x44   :  { %51 = dma.hbm_to_vmem [thread:$0]  %s4430_s2, 512, %s3920_s26, [#allocation6], %s3826_s9, %s3826_s9, %s3827_s10  }
  0x45   :  { %s3830_s21 = smov [#allocation10]   ;;  %s3831_s23 = smov [#allocation11]  }
  0x46   :  { %s69_s22 = sshll.u32 %s3830_s21, 4  ;;  %s81_s25 = sshll.u32 %s3831_s23, 4  ;;  %s70_s22 = int_to_ptr.vmem [resolvable:$true] %s69_s22  ;;  %s3957_s25 = int_to_ptr.vmem [resolvable:$true] %s81_s25 }
  0x47   :  { %s3748_s29 = scalar_lea.hbm %s4432_s4, 512 }
  0x48   :  { %p3749_p4 = scmp.ne.s32.totalorder %s4432_s4, %s3748_s29  ;;  %p3752_p5 = scmp.lt.u32.totalorder %s3748_s29, %s4432_s4 }
  0x4a   :  { %p3754_p6 = pnand %p3752_p5, %p3749_p4 }
  0x4c   :  { %3757 = shalt.err (!%p3754_p6)
}
  0x4d   :  { %s3758_s2 = scalar_lea.vmem %s70_s22, 512  ;;  %p3763_p8 = scmp.lt.s32.totalorder %s70_s22, %s70_s22 }
  0x4e   :  { %p3759_p7 = scmp.ne.s32.totalorder %s70_s22, %s3758_s2  ;;  %p3764_p9 = scmp.lt.s32.totalorder %s3758_s2, %s3758_s2 }
  0x50   :  { %p3765_p10 = por %p3764_p9, %p3763_p8 }
  0x52   :  { %p3766_p11 = pnand %p3765_p10, %p3759_p7 }
  0x54   :  { %3769 = shalt.err (!%p3766_p11)
}
  0x55   :  { %75 = dma.hbm_to_vmem [thread:$0]  %s4432_s4, 512, %s70_s22, [#allocation9], %s3826_s9, %s3826_s9, %s3827_s10  }
  0x56   :  { %s3770_s13 = scalar_lea.hbm %s4433_s5, 512 }
  0x57   :  { %p3771_p12 = scmp.ne.s32.totalorder %s4433_s5, %s3770_s13  ;;  %p3774_p13 = scmp.lt.u32.totalorder %s3770_s13, %s4433_s5 }
  0x59   :  { %p3776_p0 = pnand %p3774_p13, %p3771_p12 }
  0x5b   :  { %3779 = shalt.err (!%p3776_p0)
}
  0x5c   :  { %s3780_s18 = scalar_lea.vmem %s3957_s25, 512  ;;  %p3785_p2 = scmp.lt.s32.totalorder %s3957_s25, %s3957_s25 }
  0x5d   :  { %p3781_p1 = scmp.ne.s32.totalorder %s3957_s25, %s3780_s18  ;;  %p3786_p3 = scmp.lt.s32.totalorder %s3780_s18, %s3780_s18 }
  0x5f   :  { %p3787_p4 = por %p3786_p3, %p3785_p2 }
  0x61   :  { %p3788_p5 = pnand %p3787_p4, %p3781_p1 }
  0x63   :  { %3791 = shalt.err (!%p3788_p5)
}
  0x64   :  { %87 = dma.hbm_to_vmem [thread:$0]  %s4433_s5, 512, %s3957_s25, [#allocation12], %s3826_s9, %s3826_s9, %s3827_s10  }
  0x65   :  { %3814 = dma.done.wait [#allocation3], 256  }
  0x66   :  { %3815 = vsyncadd [#allocation3], 4294967040 }
  0x67   :  { %3816 = dma.done.wait [#allocation6], 768  }
  0x68   :  { %3817 = vsyncadd [#allocation6], 4294966528 }
  0x69   :  { %3818 = dma.done.wait [#allocation9], 1024  }
  0x6a   :  { %3819 = vsyncadd [#allocation9], 4294966272 }
  0x6b   :  { %3820 = dma.done.wait [#allocation12], 512  }
  0x6c   :  { %3821 = vsyncadd [#allocation12], 4294966784  ;;  %v196_v0 = vld [vmem:[#allocation8] sm:$0xff]  ;;  %v197_v1 = vld [vmem:[#allocation8 + $0x8] sm:$0xff]  ;;  %vm112_vm0 = vcmask 261120   ;;  %v3832_v16 = vmov 0.0  }
  0x6d   :  { %v108_v2 = vld [vmem:[#allocation7] sm:$0xff]  ;;  %v3548_v3 = vpack.c.bf16 %v197_v1, %v196_v0  ;;  %v109_v4 = vld [vmem:[#allocation7 + $0x8] sm:$0xff]  ;;  %v198_v5 = vld [vmem:[#allocation8 + $0x10] sm:$0xff]  ;;  %vm3833_vm1 = vmmov 0   ;;  %vm360_vm2 = vcmask 31744   ;;  %s3834_s5 = smov 124  }
  0x6e   :  { %v199_v6 = vld [vmem:[#allocation8 + $0x18] sm:$0xff]  ;;  %v3540_v7 = vpack.c.bf16 %v109_v4, %v108_v2  ;;  %v110_v9 = vld [vmem:[#allocation7 + $0x10] sm:$0xff]  ;;  %v106_v13 = vld [vmem:[#allocation2] sm:$0xff]  ;;  %s3835_s20 = smov 120   ;;  %s3836_s0 = smov 116   ;;  %vm438_vm3 = vcmask 64512  }
  0x6f   :  { %v3552_v8 = vpack.c.bf16 %v199_v6, %v198_v5  ;;  %v111_v10 = vld [vmem:[#allocation7 + $0x18] sm:$0xff]  ;;  %v194_v11 = vld [vmem:[#allocation5] sm:$0xff]  ;;  %3549 = vmatprep.subr.bf16.mxu1 %v3548_v3  ;;  %3344 = vmatprep.mubr.msk.f32.mxu0 %vm112_vm0, %v106_v13  ;;  %v107_v15 = vld [vmem:[#allocation2 + $0x8] sm:$0xff]  ;;  %s3837_s1 = smov 112   ;;  %s3838_s21 = smov 108   ;;  %vm1716_vm4 = vcmask 97280  }
  0x70   :  { %v3544_v12 = vpack.c.bf16 %v111_v10, %v110_v9  ;;  %3355 = vmatprep.mubr.msk.f32.mxu1 %vm112_vm0, %v194_v11  ;;  %3551 = vmatpush3.bf16.msra.mxu1 %v3548_v3  ;;  %v195_v14 = vld [vmem:[#allocation5 + $0x8] sm:$0xff]  ;;  %s3839_s22 = smov 104   ;;  %s3840_s23 = smov 100   ;;  %v281_v21 = vld [vmem:[#allocation10] sm:$0xff]  ;;  %v282_v22 = vld [vmem:[#allocation10 + $0x8] sm:$0xff]  ;;  %vm1718_vm5 = vcmask 130048  }
  0x71   :  { %3541 = vmatprep.subr.bf16.mxu0 %v3540_v7  ;;  %3553 = vmatprep.subr.bf16.mxu1 %v3552_v8  ;;  %v283_v23 = vld [vmem:[#allocation10 + $0x10] sm:$0xff]  ;;  %v3556_v24 = vpack.c.bf16 %v282_v22, %v281_v21  ;;  %v284_v25 = vld [vmem:[#allocation10 + $0x18] sm:$0xff]  ;;  %s3841_s25 = smov 4   ;;  %s3842_s27 = smov 12   ;;  %vm1720_vm6 = vcmask 162816   ;;  %vm1722_vm7 = vcmask 195584  }
  0x72   :  { %3543 = vmatpush3.bf16.msra.mxu0 %v3540_v7  ;;  %v3560_v26 = vpack.c.bf16 %v284_v25, %v283_v23  ;;  %s3843_s28 = smov 16   ;;  %s3844_s29 = smov 20   ;;  %vm1724_vm8 = vcmask 228352  }
  0x73   :  { %3545 = vmatprep.subr.bf16.mxu0 %v3544_v12  ;;  %s3845_s30 = smov 24   ;;  %s3846_s7 = smov 28  }
  0x74   :  { %3555 = vmatpush3.bf16.msra.mxu1 %v3552_v8  ;;  %s3847_s8 = smov [#allocation13]  }
  0x75   :  { %3369 = vmatprep.subr.mxu1 %v3832_v16  ;;  %s3177_s11 = sshll.u32 %s3847_s8, 4  ;;  %s3178_s11 = int_to_ptr.vmem [resolvable:$true] %s3177_s11 }
  0x76   :  { %3547 = vmatpush3.bf16.msra.mxu0 %v3544_v12  ;;  %s3792_s2 = scalar_lea.vmem %s3178_s11, 256  ;;  %p3797_p7 = scmp.lt.s32.totalorder %s3178_s11, %s3178_s11 }
  0x77   :  { %3356 = vmatmul.mubr.msk.f32.vlgmr.msra.gmra.mrb[0].mxu1 %vm112_vm0, %v195_v14  ;;  %3557 = vmatprep.subr.bf16.mxu0 %v3556_v24  ;;  %p3793_p6 = scmp.ne.s32.totalorder %s3178_s11, %s3792_s2  ;;  %p3798_p8 = scmp.lt.s32.totalorder %s3792_s2, %s3792_s2 }
  0x78   :  { %3371 = vmatprep.mubr.msk.f32.mxu1 %vm3833_vm1, %v3832_v16 }
  0x79   :  { %3345 = vmatmul.mubr.msk.f32.vlgmr.msra.gmra.mrb[0].mxu0 %vm112_vm0, %v107_v15  ;;  %p3799_p9 = por %p3798_p8, %p3797_p7 }
  0x7a   :  { %3366 = vmatprep.mubr.msk.f32.mxu0 %vm112_vm0, %v194_v11  ;;  %3559 = vmatpush3.bf16.msra.mxu0 %v3556_v24 }
  0x7b   :  { %3561 = vmatprep.subr.bf16.mxu0 %v3560_v26  ;;  %p3800_p10 = pnand %p3799_p9, %p3793_p6 }
  0x7e   :  { %3563 = vmatpush3.bf16.msra.mxu0 %v3560_v26 }
  0x7f   :  { %3389 = vmatprep.subr.mxu0 %v3832_v16 }
  0x81   :  { %3367 = vmatmul.mubr.msk.f32.vlgmr.msra.gmra.mrb[2].mxu0 %vm112_vm0, %v195_v14 }
  0x82   :  { %3391 = vmatprep.mubr.msk.f32.mxu0 %vm3833_vm1, %v3832_v16 }
 0x14a   :  { %v4002_v17 = vpop.f32.mrb[0].mxu1 }
 0x14b   :  { %v272_v18 = vpop.f32.mrb[1].mxu1 }
 0x14c   :  { %v4004_v19 = vpop.f32.mrb[0].mxu0  ;;  %525 = vrot.lane.b32.xlu1 %v272_v18, %s3834_s5  ;;  %3370 = vmatpush3.xpose.msk.msra.mxu1 %vm360_vm2, %v272_v18 }
 0x14d   :  { %v185_v20 = vpop.f32.mrb[1].mxu0  ;;  %3374 = vmatprep.subr.mxu1 %v3832_v16 }
 0x14f   :  { %3372 = vmatmul.mubr.msk.f32.vlgmr.msra.gmra.mrb[2].mxu1 %vm360_vm2, %v185_v20 }
 0x150   :  { %523 = vrot.lane.b32.xlu1 %v185_v20, %s3834_s5  ;;  %3376 = vmatprep.mubr.msk.f32.mxu1 %vm3833_vm1, %v3832_v16 }
 0x154   :  { %690 = vrot.lane.b32.xlu1 %v185_v20, %s3835_s20  ;;  %v4041_v36 = vpop.f32.mrb[2].mxu0 }
 0x155   :  { %v4043_v37 = vpop.f32.mrb[3].mxu0 }
 0x156   :  { %3375 = vmatpush3.msra.mxu1 %v4043_v37 }
 0x157   :  { %3379 = vmatprep.subr.mxu1 %v3832_v16 }
 0x158   :  { %858 = vrot.lane.b32.xlu1 %v272_v18, %s3836_s0 }
 0x15c   :  { %856 = vrot.lane.b32.xlu1 %v185_v20, %s3836_s0 }
 0x160   :  { %1024 = vrot.lane.b32.xlu1 %v272_v18, %s3837_s1 }
 0x164   :  { %1022 = vrot.lane.b32.xlu1 %v185_v20, %s3837_s1 }
 0x168   :  { %1190 = vrot.lane.b32.xlu1 %v272_v18, %s3838_s21 }
 0x16c   :  { %1356 = vrot.lane.b32.xlu1 %v272_v18, %s3839_s22 }
 0x170   :  { %1522 = vrot.lane.b32.xlu1 %v272_v18, %s3840_s23 }
 0x174   :  { %1889 = vrot.lane.b32.xlu1 %v4002_v17, %s3834_s5 }
 0x178   :  { %2056 = vrot.lane.b32.xlu1 %v4002_v17, %s3835_s20 }
 0x17c   :  { %2222 = vrot.lane.b32.xlu1 %v4002_v17, %s3836_s0 }
 0x180   :  { %2388 = vrot.lane.b32.xlu1 %v4002_v17, %s3837_s1 }
 0x184   :  { %2554 = vrot.lane.b32.xlu1 %v4002_v17, %s3838_s21 }
 0x188   :  { %2720 = vrot.lane.b32.xlu1 %v4002_v17, %s3839_s22 }
 0x18c   :  { %2886 = vrot.lane.b32.xlu1 %v4002_v17, %s3840_s23 }
 0x1be   :  { %v526_v38 = vpop.permute.xlu1 %525 }
 0x1c2   :  { %v524_v39 = vpop.permute.xlu1 %523 }
 0x1c6   :  { %v691_v40 = vpop.permute.xlu1 %690 }
 0x1ca   :  { %v859_v41 = vpop.permute.xlu1 %858 }
 0x1ce   :  { %v857_v42 = vpop.permute.xlu1 %856 }
 0x1d2   :  { %v1025_v43 = vpop.permute.xlu1 %1024 }
 0x1d6   :  { %v1023_v44 = vpop.permute.xlu1 %1022 }
 0x1da   :  { %v1191_v46 = vpop.permute.xlu1 %1190 }
 0x1de   :  { %v1357_v48 = vpop.permute.xlu1 %1356 }
 0x1e2   :  { %v1523_v53 = vpop.permute.xlu1 %1522 }
 0x1e6   :  { %v1890_v55 = vpop.permute.xlu1 %1889 }
 0x1ea   :  { %v2057_v57 = vpop.permute.xlu1 %2056 }
 0x1ee   :  { %v2223_v59 = vpop.permute.xlu1 %2222 }
 0x1f2   :  { %v2389_v61 = vpop.permute.xlu1 %2388 }
 0x1f6   :  { %v2555_v63 = vpop.permute.xlu1 %2554 }
 0x1fa   :  { %v2721_v1 = vpop.permute.xlu1 %2720 }
 0x1fe   :  { %v2887_v3 = vpop.permute.xlu1 %2886 }
 0x222   :  { %v433_v27 = vpop.f32.mrb[2].mxu1 }
 0x223   :  { %v437_v28 = vmul.f32 0.5, %v433_v27  ;;  %v3373_v29 = vpop.f32.mrb[3].mxu1 }
 0x225   :  { %v439_v30 = vsel %vm438_vm3, %v437_v28, -inf }
 0x226   :  { %440 = vmax.xlane.f32.xlu0 %v439_v30 }
 0x2b3   :  { %v441_v31 = vpop.xlane.xlu0 %440 }
 0x2b4   :  { %v442_v32 = vsub.f32 %v437_v28, %v441_v31 }
 0x2b6   :  { %v443_v33 = vmul.f32 1.442695, %v442_v32 }
 0x2b8   :  { %3596 = vpow2.f32 %v443_v33 }
 0x2c2   :  { %v3597_v34 = vpop.eup %3596 }
 0x2c3   :  { %v445_v35 = vsel %vm438_vm3, %v3597_v34, 0.0 }
 0x2c4   :  { %446 = vadd.xlane.f32.xlu0 %v445_v35 }
 0x2da   :  { %692 = vrot.lane.b32.xlu0 %v272_v18, %s3835_s20 }
 0x2de   :  { %1188 = vrot.lane.b32.xlu0 %v185_v20, %s3838_s21 }
 0x2e2   :  { %1354 = vrot.lane.b32.xlu0 %v185_v20, %s3839_s22 }
 0x2e6   :  { %1520 = vrot.lane.b32.xlu0 %v185_v20, %s3840_s23 }
 0x2ea   :  { %1887 = vrot.lane.b32.xlu0 %v4004_v19, %s3834_s5 }
 0x2ee   :  { %2054 = vrot.lane.b32.xlu0 %v4004_v19, %s3835_s20 }
 0x2f2   :  { %2220 = vrot.lane.b32.xlu0 %v4004_v19, %s3836_s0 }
 0x2f6   :  { %2386 = vrot.lane.b32.xlu0 %v4004_v19, %s3837_s1 }
 0x2fa   :  { %2552 = vrot.lane.b32.xlu0 %v4004_v19, %s3838_s21 }
 0x2fe   :  { %2718 = vrot.lane.b32.xlu0 %v4004_v19, %s3839_s22 }
 0x302   :  { %2884 = vrot.lane.b32.xlu0 %v4004_v19, %s3840_s23 }
 0x351   :  { %v447_v45 = vpop.xlane.xlu0 %446 }
 0x352   :  { %3598 = vrcp.f32 %v447_v45 }
 0x355   :  { %v693_v47 = vpop.permute.xlu0 %692 }
 0x356   :  { %3390 = vmatpush3.xpose.msk.msra.mxu0 %vm360_vm2, %v693_v47 }
 0x357   :  { %3399 = vmatprep.subr.mxu0 %v3832_v16 }
 0x359   :  { %3392 = vmatmul.mubr.msk.f32.vlgmr.msra.gmra.mrb[4].mxu0 %vm360_vm2, %v691_v40  ;;  %v1189_v49 = vpop.permute.xlu0 %1188 }
 0x35a   :  { %3400 = vmatpush3.xpose.msk.msra.mxu0 %vm360_vm2, %v859_v41  ;;  %3401 = vmatprep.mubr.msk.f32.mxu0 %vm3833_vm1, %v3832_v16 }
 0x35b   :  { %3409 = vmatprep.subr.mxu0 %v3832_v16 }
 0x35c   :  { %v3599_v50 = vpop.eup %3598 }
 0x35d   :  { %v449_v51 = vmul.f32 %v3599_v50, %v3597_v34  ;;  %3402 = vmatmul.mubr.msk.f32.vlgmr.msra.gmra.mrb[6].mxu0 %vm360_vm2, %v857_v42  ;;  %v1355_v52 = vpop.permute.xlu0 %1354 }
 0x35e   :  { %3410 = vmatpush3.xpose.msk.msra.mxu0 %vm360_vm2, %v1025_v43  ;;  %3411 = vmatprep.mubr.msk.f32.mxu0 %vm3833_vm1, %v3832_v16 }
 0x35f   :  { %3377 = vmatmul.mubr.msk.f32.vlgmr.msra.gmra.mrb[4].mxu1 %vm438_vm3, %v449_v51  ;;  %3419 = vmatprep.subr.mxu0 %v3832_v16 }
 0x360   :  { %3380 = vmatpush3.xpose.msk.msra.mxu1 %vm360_vm2, %v526_v38  ;;  %3381 = vmatprep.mubr.msk.f32.mxu1 %vm3833_vm1, %v3832_v16 }
 0x361   :  { %3412 = vmatmul.mubr.msk.f32.vlgmr.msra.gmra.mrb[8].mxu0 %vm360_vm2, %v1023_v44  ;;  %3384 = vmatprep.subr.mxu1 %v3832_v16  ;;  %v1521_v54 = vpop.permute.xlu0 %1520 }
 0x362   :  { %3420 = vmatpush3.xpose.msk.msra.mxu0 %vm360_vm2, %v1191_v46  ;;  %3421 = vmatprep.mubr.msk.f32.mxu0 %vm3833_vm1, %v3832_v16 }
 0x363   :  { %3382 = vmatmul.mubr.msk.f32.vlgmr.msra.gmra.mrb[6].mxu1 %vm360_vm2, %v524_v39  ;;  %3429 = vmatprep.subr.mxu0 %v3832_v16 }
 0x364   :  { %3386 = vmatprep.mubr.msk.f32.mxu1 %vm3833_vm1, %v3832_v16 }
 0x365   :  { %3422 = vmatmul.mubr.msk.f32.vlgmr.msra.gmra.mrb[10].mxu0 %vm360_vm2, %v1189_v49  ;;  %v1888_v56 = vpop.permute.xlu0 %1887 }
 0x366   :  { %3430 = vmatpush3.xpose.msk.msra.mxu0 %vm360_vm2, %v1357_v48  ;;  %3431 = vmatprep.mubr.msk.f32.mxu0 %vm3833_vm1, %v3832_v16 }
 0x367   :  { %3439 = vmatprep.subr.mxu0 %v3832_v16 }
 0x369   :  { %3432 = vmatmul.mubr.msk.f32.vlgmr.msra.gmra.mrb[12].mxu0 %vm360_vm2, %v1355_v52  ;;  %v2055_v58 = vpop.permute.xlu0 %2054 }
 0x36a   :  { %3440 = vmatpush3.xpose.msk.msra.mxu0 %vm360_vm2, %v1523_v53  ;;  %3441 = vmatprep.mubr.msk.f32.mxu0 %vm3833_vm1, %v3832_v16 }
 0x36b   :  { %3449 = vmatprep.subr.mxu0 %v3832_v16 }
 0x36d   :  { %3442 = vmatmul.mubr.msk.f32.vlgmr.msra.gmra.mrb[14].mxu0 %vm360_vm2, %v1521_v54  ;;  %v2221_v60 = vpop.permute.xlu0 %2220 }
 0x36e   :  { %3450 = vmatpush3.xpose.msk.msra.mxu0 %vm360_vm2, %v4002_v17  ;;  %3451 = vmatprep.mubr.msk.f32.mxu0 %vm3833_vm1, %v3832_v16 }
 0x36f   :  { %3459 = vmatprep.subr.mxu0 %v3832_v16 }
 0x371   :  { %3452 = vmatmul.mubr.msk.f32.vlgmr.msra.gmra.mrb[16].mxu0 %vm360_vm2, %v4004_v19  ;;  %v2387_v62 = vpop.permute.xlu0 %2386 }
 0x372   :  { %3460 = vmatpush3.xpose.msk.msra.mxu0 %vm360_vm2, %v1890_v55  ;;  %3461 = vmatprep.mubr.msk.f32.mxu0 %vm3833_vm1, %v3832_v16 }
 0x373   :  { %3469 = vmatprep.subr.mxu0 %v3832_v16 }
 0x375   :  { %3462 = vmatmul.mubr.msk.f32.vlgmr.msra.gmra.mrb[18].mxu0 %vm360_vm2, %v1888_v56  ;;  %v2553_v0 = vpop.permute.xlu0 %2552 }
 0x376   :  { %3470 = vmatpush3.xpose.msk.msra.mxu0 %vm360_vm2, %v2057_v57  ;;  %3471 = vmatprep.mubr.msk.f32.mxu0 %vm3833_vm1, %v3832_v16 }
 0x377   :  { %3479 = vmatprep.subr.mxu0 %v3832_v16 }
 0x379   :  { %3472 = vmatmul.mubr.msk.f32.vlgmr.msra.gmra.mrb[20].mxu0 %vm360_vm2, %v2055_v58  ;;  %v2719_v2 = vpop.permute.xlu0 %2718 }
 0x37a   :  { %3480 = vmatpush3.xpose.msk.msra.mxu0 %vm360_vm2, %v2223_v59  ;;  %3481 = vmatprep.mubr.msk.f32.mxu0 %vm3833_vm1, %v3832_v16 }
 0x37b   :  { %3489 = vmatprep.subr.mxu0 %v3832_v16 }
 0x37d   :  { %3482 = vmatmul.mubr.msk.f32.vlgmr.msra.gmra.mrb[22].mxu0 %vm360_vm2, %v2221_v60  ;;  %v2885_v4 = vpop.permute.xlu0 %2884 }
 0x37e   :  { %3490 = vmatpush3.xpose.msk.msra.mxu0 %vm360_vm2, %v2389_v61  ;;  %3491 = vmatprep.mubr.msk.f32.mxu0 %vm3833_vm1, %v3832_v16 }
 0x37f   :  { %3499 = vmatprep.subr.mxu0 %v3832_v16 }
 0x381   :  { %3492 = vmatmul.mubr.msk.f32.vlgmr.msra.gmra.mrb[24].mxu0 %vm360_vm2, %v2387_v62 }
 0x382   :  { %3500 = vmatpush3.xpose.msk.msra.mxu0 %vm360_vm2, %v2555_v63  ;;  %3501 = vmatprep.mubr.msk.f32.mxu0 %vm3833_vm1, %v3832_v16 }
 0x383   :  { %3509 = vmatprep.subr.mxu0 %v3832_v16 }
 0x385   :  { %3502 = vmatmul.mubr.msk.f32.vlgmr.msra.gmra.mrb[26].mxu0 %vm360_vm2, %v2553_v0 }
 0x386   :  { %3510 = vmatpush3.xpose.msk.msra.mxu0 %vm360_vm2, %v2721_v1  ;;  %3511 = vmatprep.mubr.msk.f32.mxu0 %vm3833_vm1, %v3832_v16 }
 0x387   :  { %3519 = vmatprep.subr.mxu0 %v3832_v16 }
 0x389   :  { %3512 = vmatmul.mubr.msk.f32.vlgmr.msra.gmra.mrb[28].mxu0 %vm360_vm2, %v2719_v2 }
 0x38a   :  { %3520 = vmatpush3.xpose.msk.msra.mxu0 %vm360_vm2, %v2887_v3  ;;  %3521 = vmatprep.mubr.msk.f32.mxu0 %vm3833_vm1, %v3832_v16 }
 0x38d   :  { %3522 = vmatmul.mubr.msk.f32.vlgmr.msra.gmra.mrb[30].mxu0 %vm360_vm2, %v2885_v4 }
 0x42c   :  { %v764_v5 = vpop.f32.mrb[4].mxu0 }
 0x42d   :  { %v4142_v6 = vmul.f32 0.5, %v764_v5  ;;  %v3393_v7 = vpop.f32.mrb[5].mxu0 }
 0x42f   :  { %v769_v8 = vsel %vm438_vm3, %v4142_v6, -inf }
 0x430   :  { %770 = vmax.xlane.f32.xlu0 %v769_v8  ;;  %v930_v9 = vpop.f32.mrb[6].mxu0 }
 0x431   :  { %v4146_v10 = vmul.f32 0.5, %v930_v9  ;;  %v3403_v11 = vpop.f32.mrb[7].mxu0 }
 0x432   :  { %v4148_v12 = vpop.f32.mrb[4].mxu1 }
 0x433   :  { %v3378_v13 = vpop.f32.mrb[5].mxu1  ;;  %v935_v14 = vsel %vm438_vm3, %v4146_v10, -inf }
 0x434   :  { %936 = vmax.xlane.f32.xlu0 %v935_v14  ;;  %v1096_v15 = vpop.f32.mrb[8].mxu0 }
 0x435   :  { %v4152_v17 = vmul.f32 0.5, %v1096_v15  ;;  %v3413_v18 = vpop.f32.mrb[9].mxu0 }
 0x436   :  { %v4154_v19 = vpop.f32.mrb[6].mxu1 }
 0x437   :  { %v3383_v20 = vpop.f32.mrb[7].mxu1  ;;  %v1101_v21 = vsel %vm438_vm3, %v4152_v17, -inf }
 0x438   :  { %1102 = vmax.xlane.f32.xlu1 %v1101_v21  ;;  %v1262_v22 = vpop.f32.mrb[10].mxu0 }
 0x439   :  { %v4158_v23 = vmul.f32 0.5, %v1262_v22  ;;  %v3423_v24 = vpop.f32.mrb[11].mxu0 }
 0x43b   :  { %v1267_v25 = vsel %vm438_vm3, %v4158_v23, -inf }
 0x43c   :  { %1268 = vmax.xlane.f32.xlu0 %v1267_v25  ;;  %v1428_v26 = vpop.f32.mrb[12].mxu0 }
 0x43d   :  { %v4162_v27 = vmul.f32 0.5, %v1428_v26  ;;  %v3433_v28 = vpop.f32.mrb[13].mxu0 }
 0x43f   :  { %v1433_v29 = vsel %vm438_vm3, %v4162_v27, -inf }
 0x440   :  { %1434 = vmax.xlane.f32.xlu1 %v1433_v29  ;;  %v1594_v30 = vpop.f32.mrb[14].mxu0 }
 0x441   :  { %v4166_v31 = vmul.f32 0.5, %v1594_v30  ;;  %v3443_v32 = vpop.f32.mrb[15].mxu0 }
 0x443   :  { %v1599_v33 = vsel %vm438_vm3, %v4166_v31, -inf }
 0x444   :  { %1600 = vmax.xlane.f32.xlu0 %v1599_v33  ;;  %v1798_v34 = vpop.f32.mrb[16].mxu0 }
 0x445   :  { %v4170_v35 = vmul.f32 0.5, %v1798_v34  ;;  %v3453_v38 = vpop.f32.mrb[17].mxu0 }
 0x447   :  { %v1803_v39 = vsel %vm438_vm3, %v4170_v35, -inf }
 0x448   :  { %1804 = vmax.xlane.f32.xlu1 %v1803_v39  ;;  %v1961_v40 = vpop.f32.mrb[18].mxu0 }
 0x449   :  { %v4174_v41 = vmul.f32 0.5, %v1961_v40  ;;  %v3463_v42 = vpop.f32.mrb[19].mxu0 }
 0x44b   :  { %v1966_v43 = vsel %vm438_vm3, %v4174_v41, -inf }
 0x44c   :  { %1967 = vmax.xlane.f32.xlu0 %v1966_v43  ;;  %v2128_v44 = vpop.f32.mrb[20].mxu0 }
 0x44d   :  { %v4178_v45 = vmul.f32 0.5, %v2128_v44  ;;  %v3473_v46 = vpop.f32.mrb[21].mxu0 }
 0x44f   :  { %v2133_v47 = vsel %vm438_vm3, %v4178_v45, -inf }
 0x450   :  { %2134 = vmax.xlane.f32.xlu1 %v2133_v47  ;;  %v2294_v48 = vpop.f32.mrb[22].mxu0 }
 0x451   :  { %v4182_v49 = vmul.f32 0.5, %v2294_v48  ;;  %v3483_v50 = vpop.f32.mrb[23].mxu0 }
 0x453   :  { %v2299_v51 = vsel %vm438_vm3, %v4182_v49, -inf }
 0x454   :  { %2300 = vmax.xlane.f32.xlu0 %v2299_v51  ;;  %v2460_v52 = vpop.f32.mrb[24].mxu0 }
 0x455   :  { %v4186_v53 = vmul.f32 0.5, %v2460_v52  ;;  %v3493_v54 = vpop.f32.mrb[25].mxu0 }
 0x457   :  { %v2465_v55 = vsel %vm438_vm3, %v4186_v53, -inf }
 0x458   :  { %2466 = vmax.xlane.f32.xlu1 %v2465_v55  ;;  %v2626_v56 = vpop.f32.mrb[26].mxu0 }
 0x459   :  { %v3503_v57 = vpop.f32.mrb[27].mxu0  ;;  %v4196_v62 = vmul.f32 0.5, %v2626_v56 }
 0x45b   :  { %v2631_v0 = vsel %vm438_vm3, %v4196_v62, -inf }
 0x45c   :  { %v2792_v58 = vpop.f32.mrb[28].mxu0 }
 0x45d   :  { %v3513_v59 = vpop.f32.mrb[29].mxu0  ;;  %v4202_v1 = vmul.f32 0.5, %v2792_v58 }
 0x45f   :  { %v2797_v3 = vsel %vm438_vm3, %v4202_v1, -inf }
 0x460   :  { %v2958_v60 = vpop.f32.mrb[30].mxu0 }
 0x461   :  { %v3523_v61 = vpop.f32.mrb[31].mxu0  ;;  %v4198_v63 = vmul.f32 0.5, %v2958_v60 }
 0x463   :  { %v2963_v2 = vsel %vm438_vm3, %v4198_v63, -inf }
 0x469   :  { %780 = vrot.lane.b32.xlu1 %v4043_v37, %s3835_s20 }
 0x46a   :  { %614 = vrot.lane.b32.xlu0 %v4043_v37, %s3834_s5 }
 0x46d   :  { %946 = vrot.lane.b32.xlu1 %v4043_v37, %s3836_s0 }
 0x489   :  { %2632 = vmax.xlane.f32.xlu0 %v2631_v0 }
 0x48d   :  { %2964 = vmax.xlane.f32.xlu0 %v2963_v2 }
 0x491   :  { %2798 = vmax.xlane.f32.xlu1 %v2797_v3 }
 0x4a3   :  { %1112 = vrot.lane.b32.xlu0 %v4043_v37, %s3837_s1 }
 0x4bd   :  { %v771_v4 = vpop.xlane.xlu0 %770 }
 0x4be   :  { %v772_v5 = vsub.f32 %v4142_v6, %v771_v4 }
 0x4c0   :  { %v773_v7 = vmul.f32 1.442695, %v772_v5 }
 0x4c1   :  { %v937_v8 = vpop.xlane.xlu0 %936 }
 0x4c2   :  { %3600 = vpow2.f32 %v773_v7  ;;  %v938_v9 = vsub.f32 %v4146_v10, %v937_v8 }
 0x4c4   :  { %v939_v11 = vmul.f32 1.442695, %v938_v9 }
 0x4c5   :  { %v1103_v13 = vpop.xlane.xlu1 %1102 }
 0x4c6   :  { %3602 = vpow2.f32 %v939_v11  ;;  %v1104_v14 = vsub.f32 %v4152_v17, %v1103_v13 }
 0x4c8   :  { %v1105_v15 = vmul.f32 1.442695, %v1104_v14 }
 0x4c9   :  { %v1269_v18 = vpop.xlane.xlu0 %1268 }
 0x4ca   :  { %3604 = vpow2.f32 %v1105_v15  ;;  %v1270_v20 = vsub.f32 %v4158_v23, %v1269_v18 }
 0x4cc   :  { %v4214_v21 = vpop.eup %3600  ;;  %v1271_v22 = vmul.f32 1.442695, %v1270_v20 }
 0x4cd   :  { %v1435_v24 = vpop.xlane.xlu1 %1434  ;;  %v775_v6 = vsel %vm438_vm3, %v4214_v21, 0.0 }
 0x4ce   :  { %3606 = vpow2.f32 %v1271_v22  ;;  %v1436_v10 = vsub.f32 %v4162_v27, %v1435_v24  ;;  %776 = vadd.xlane.f32.xlu0 %v775_v6 }
 0x4d0   :  { %v4219_v25 = vpop.eup %3602  ;;  %v1437_v26 = vmul.f32 1.442695, %v1436_v10 }
 0x4d1   :  { %v1601_v17 = vpop.xlane.xlu0 %1600  ;;  %v941_v28 = vsel %vm438_vm3, %v4219_v25, 0.0 }
 0x4d2   :  { %3608 = vpow2.f32 %v1437_v26  ;;  %v1602_v23 = vsub.f32 %v4166_v31, %v1601_v17  ;;  %942 = vadd.xlane.f32.xlu1 %v941_v28 }
 0x4d4   :  { %v4224_v29 = vpop.eup %3604  ;;  %v1603_v30 = vmul.f32 1.442695, %v1602_v23 }
 0x4d5   :  { %v1805_v32 = vpop.xlane.xlu1 %1804  ;;  %v1107_v33 = vsel %vm438_vm3, %v4224_v29, 0.0 }
 0x4d6   :  { %3610 = vpow2.f32 %v1603_v30  ;;  %v1806_v27 = vsub.f32 %v4170_v35, %v1805_v32  ;;  %1108 = vadd.xlane.f32.xlu0 %v1107_v33 }
 0x4d8   :  { %v4229_v34 = vpop.eup %3606  ;;  %v1807_v38 = vmul.f32 1.442695, %v1806_v27 }
 0x4d9   :  { %v1968_v39 = vpop.xlane.xlu0 %1967  ;;  %v1273_v40 = vsel %vm438_vm3, %v4229_v34, 0.0 }
 0x4da   :  { %3612 = vpow2.f32 %v1807_v38  ;;  %v1969_v31 = vsub.f32 %v4174_v41, %v1968_v39  ;;  %1274 = vadd.xlane.f32.xlu1 %v1273_v40 }
 0x4dc   :  { %v4234_v42 = vpop.eup %3608  ;;  %v1970_v43 = vmul.f32 1.442695, %v1969_v31 }
 0x4dd   :  { %v2135_v44 = vpop.xlane.xlu1 %2134  ;;  %v1439_v46 = vsel %vm438_vm3, %v4234_v42, 0.0 }
 0x4de   :  { %3614 = vpow2.f32 %v1970_v43  ;;  %v2136_v35 = vsub.f32 %v4178_v45, %v2135_v44  ;;  %1440 = vadd.xlane.f32.xlu0 %v1439_v46 }
 0x4e0   :  { %v4239_v47 = vpop.eup %3610  ;;  %v2137_v48 = vmul.f32 1.442695, %v2136_v35 }
 0x4e1   :  { %v2301_v50 = vpop.xlane.xlu0 %2300  ;;  %v1605_v51 = vsel %vm438_vm3, %v4239_v47, 0.0 }
 0x4e2   :  { %3616 = vpow2.f32 %v2137_v48  ;;  %v2302_v41 = vsub.f32 %v4182_v49, %v2301_v50  ;;  %1606 = vadd.xlane.f32.xlu1 %v1605_v51 }
 0x4e4   :  { %v4244_v52 = vpop.eup %3612  ;;  %v2303_v54 = vmul.f32 1.442695, %v2302_v41 }
 0x4e5   :  { %v615_v55 = vpop.permute.xlu0 %614  ;;  %v2467_v56 = vpop.xlane.xlu1 %2466  ;;  %v1809_v45 = vsel %vm438_vm3, %v4244_v52, 0.0 }
 0x4e6   :  { %3618 = vpow2.f32 %v2303_v54  ;;  %v2468_v57 = vsub.f32 %v4186_v53, %v2467_v56  ;;  %1810 = vadd.xlane.f32.xlu1 %v1809_v45  ;;  %3385 = vmatpush3.msra.mxu1 %v615_v55  ;;  %v601_v53 = vmul.f32 0.5, %v4154_v19 }
 0x4e7   :  { %3394 = vmatprep.subr.mxu1 %v3832_v16 }
 0x4e8   :  { %v4250_v58 = vpop.eup %3614  ;;  %v2469_v59 = vmul.f32 1.442695, %v2468_v57  ;;  %v602_v5 = vsel %vm438_vm3, %v601_v53, -inf }
 0x4e9   :  { %v1972_v49 = vsel %vm438_vm3, %v4250_v58, 0.0  ;;  %v781_v14 = vpop.permute.xlu1 %780 }
 0x4ea   :  { %3620 = vpow2.f32 %v2469_v59  ;;  %1973 = vadd.xlane.f32.xlu0 %v1972_v49 }
 0x4ec   :  { %v4254_v60 = vpop.eup %3616 }
 0x4ed   :  { %v2139_v61 = vsel %vm438_vm3, %v4254_v60, 0.0  ;;  %v947_v15 = vpop.permute.xlu1 %946 }
 0x4ee   :  { %2140 = vadd.xlane.f32.xlu1 %v2139_v61 }
 0x4f0   :  { %v4258_v0 = vpop.eup %3618 }
 0x4f1   :  { %v2305_v2 = vsel %vm438_vm3, %v4258_v0, 0.0 }
 0x4f2   :  { %2306 = vadd.xlane.f32.xlu1 %v2305_v2 }
 0x4f4   :  { %v4263_v3 = vpop.eup %3620 }
 0x4f5   :  { %v2471_v4 = vsel %vm438_vm3, %v4263_v3, 0.0 }
 0x4f6   :  { %2472 = vadd.xlane.f32.xlu0 %v2471_v4  ;;  %603 = vmax.xlane.f32.xlu1 %v602_v5 }
 0x507   :  { %1278 = vrot.lane.b32.xlu1 %v4043_v37, %s3838_s21 }
 0x50c   :  { %1610 = vrot.lane.b32.xlu0 %v4043_v37, %s3840_s23 }
 0x516   :  { %v2633_v19 = vpop.xlane.xlu0 %2632 }
 0x517   :  { %v2634_v32 = vsub.f32 %v4196_v62, %v2633_v19 }
 0x519   :  { %v2635_v33 = vmul.f32 1.442695, %v2634_v32 }
 0x51a   :  { %v2965_v7 = vpop.xlane.xlu0 %2964 }
 0x51b   :  { %v2966_v8 = vsub.f32 %v4198_v63, %v2965_v7 }
 0x51d   :  { %v2967_v9 = vmul.f32 1.442695, %v2966_v8 }
 0x51e   :  { %v2799_v18 = vpop.xlane.xlu1 %2798 }
 0x51f   :  { %3622 = vpow2.f32 %v2967_v9  ;;  %v2800_v27 = vsub.f32 %v4202_v1, %v2799_v18 }
 0x521   :  { %v2801_v38 = vmul.f32 1.442695, %v2800_v27 }
 0x529   :  { %v4273_v11 = vpop.eup %3622 }
 0x52a   :  { %v2969_v13 = vsel %vm438_vm3, %v4273_v11, 0.0 }
 0x52b   :  { %2970 = vadd.xlane.f32.xlu0 %v2969_v13 }
 0x541   :  { %2808 = vrot.lane.b32.xlu0 %v4041_v36, %s3839_s22 }
 0x55f   :  { %v943_v20 = vpop.xlane.xlu1 %942 }
 0x567   :  { %v1275_v22 = vpop.xlane.xlu1 %1274 }
 0x56f   :  { %v1607_v24 = vpop.xlane.xlu1 %1606 }
 0x573   :  { %v4279_v6 = vpop.xlane.xlu1 %1810 }
 0x57b   :  { %v4281_v63 = vpop.xlane.xlu1 %2140 }
 0x57f   :  { %v4283_v10 = vpop.xlane.xlu1 %2306 }
 0x583   :  { %v604_v26 = vpop.xlane.xlu1 %603 }
 0x584   :  { %v605_v17 = vsub.f32 %v601_v53, %v604_v26 }
 0x586   :  { %v606_v28 = vmul.f32 1.442695, %v605_v17 }
 0x587   :  { %v1279_v62 = vpop.permute.xlu1 %1278 }
 0x588   :  { %3624 = vpow2.f32 %v606_v28 }
 0x589   :  { %3626 = vpow2.f32 %v2635_v33 }
 0x58a   :  { %3628 = vpow2.f32 %v2801_v38 }
 0x592   :  { %v3625_v23 = vpop.eup %3624 }
 0x593   :  { %v608_v30 = vsel %vm438_vm3, %v3625_v23, 0.0  ;;  %v4290_v39 = vpop.eup %3626 }
 0x594   :  { %609 = vadd.xlane.f32.xlu1 %v608_v30  ;;  %v2637_v40 = vsel %vm438_vm3, %v4290_v39, 0.0  ;;  %v4294_v31 = vpop.eup %3628 }
 0x595   :  { %v2803_v43 = vsel %vm438_vm3, %v4294_v31, 0.0 }
 0x5a5   :  { %1444 = vrot.lane.b32.xlu1 %v4043_v37, %s3839_s22  ;;  %v1113_v37 = vpop.permute.xlu0 %1112 }
 0x5a9   :  { %v777_v1 = vpop.xlane.xlu0 %776 }
 0x5ad   :  { %v1109_v46 = vpop.xlane.xlu0 %1108 }
 0x5b1   :  { %v1441_v41 = vpop.xlane.xlu0 %1440 }
 0x5b5   :  { %v1974_v45 = vpop.xlane.xlu0 %1973 }
 0x5b9   :  { %v2473_v59 = vpop.xlane.xlu0 %2472 }
 0x5bd   :  { %v1611_v2 = vpop.permute.xlu0 %1610 }
 0x5c9   :  { %2638 = vadd.xlane.f32.xlu1 %v2637_v40 }
 0x5cd   :  { %2804 = vadd.xlane.f32.xlu1 %v2803_v43 }
 0x5de   :  { %1978 = vrot.lane.b32.xlu1 %v4041_v36, %s3834_s5 }
 0x5e2   :  { %2144 = vrot.lane.b32.xlu1 %v4041_v36, %s3835_s20 }
 0x5e6   :  { %2310 = vrot.lane.b32.xlu1 %v4041_v36, %s3836_s0 }
 0x5ea   :  { %2476 = vrot.lane.b32.xlu1 %v4041_v36, %s3837_s1 }
 0x5ee   :  { %2642 = vrot.lane.b32.xlu1 %v4041_v36, %s3838_s21 }
 0x5f2   :  { %2974 = vrot.lane.b32.xlu1 %v4041_v36, %s3840_s23 }
 0x621   :  { %v610_v44 = vpop.xlane.xlu1 %609 }
 0x622   :  { %3630 = vrcp.f32 %v610_v44 }
 0x623   :  { %3632 = vrcp.f32 %v777_v1 }
 0x624   :  { %3634 = vrcp.f32 %v943_v20 }
 0x625   :  { %3636 = vrcp.f32 %v1109_v46  ;;  %v1445_v61 = vpop.permute.xlu1 %1444 }
 0x626   :  { %3638 = vrcp.f32 %v1275_v22 }
 0x627   :  { %3640 = vrcp.f32 %v1441_v41 }
 0x628   :  { %3642 = vrcp.f32 %v1607_v24 }
 0x629   :  { %3644 = vrcp.f32 %v4279_v6 }
 0x62a   :  { %3646 = vrcp.f32 %v1974_v45 }
 0x62b   :  { %3648 = vrcp.f32 %v4281_v63 }
 0x62c   :  { %v3631_v35 = vpop.eup %3630  ;;  %3650 = vrcp.f32 %v4283_v10 }
 0x62d   :  { %v612_v48 = vmul.f32 %v3631_v35, %v3625_v23  ;;  %v3633_v50 = vpop.eup %3632  ;;  %3652 = vrcp.f32 %v2473_v59  ;;  %v3085_v35 = vld [vmem:[#allocation11] sm:$0xff] }
 0x62e   :  { %v779_v51 = vmul.f32 %v3633_v50, %v4214_v21  ;;  %v3635_v54 = vpop.eup %3634 }
 0x62f   :  { %3387 = vmatmul.mubr.msk.f32.vlgmr.msra.gmra.mrb[8].mxu1 %vm438_vm3, %v612_v48  ;;  %v945_v55 = vmul.f32 %v3635_v54, %v4219_v25  ;;  %v3637_v56 = vpop.eup %3636  ;;  %v3086_v48 = vld [vmem:[#allocation11 + $0x8] sm:$0xff]  ;;  %v3087_v54 = vld [vmem:[#allocation11 + $0x10] sm:$0xff] }
 0x630   :  { %3395 = vmatpush3.msra.mxu1 %v781_v14  ;;  %3396 = vmatprep.mubr.msk.f32.mxu1 %vm3833_vm1, %v3832_v16  ;;  %v1111_v21 = vmul.f32 %v3637_v56, %v4224_v29  ;;  %v3639_v57 = vpop.eup %3638  ;;  %v2971_v14 = vpop.xlane.xlu0 %2970 }
 0x631   :  { %3404 = vmatprep.subr.mxu1 %v3832_v16  ;;  %v1277_v25 = vmul.f32 %v3639_v57, %v4229_v34  ;;  %v3641_v49 = vpop.eup %3640 }
 0x632   :  { %v1443_v29 = vmul.f32 %v3641_v49, %v4234_v42  ;;  %v3643_v53 = vpop.eup %3642 }
 0x633   :  { %3397 = vmatmul.mubr.msk.f32.vlgmr.msra.gmra.mrb[10].mxu1 %vm438_vm3, %v779_v51  ;;  %v1609_v34 = vmul.f32 %v3643_v53, %v4239_v47  ;;  %v3645_v4 = vpop.eup %3644  ;;  %v3564_v51 = vpack.c.bf16 %v3086_v48, %v3085_v35 }
 0x634   :  { %3405 = vmatpush3.msra.mxu1 %v947_v15  ;;  %3406 = vmatprep.mubr.msk.f32.mxu1 %vm3833_vm1, %v3832_v16  ;;  %v1813_v42 = vmul.f32 %v3645_v4, %v4244_v52  ;;  %v2809_v63 = vpop.permute.xlu0 %2808 }
 0x635   :  { %3414 = vmatprep.subr.mxu1 %v3832_v16  ;;  %3565 = vmatprep.subr.bf16.mxu0 %v3564_v51 }
 0x636   :  { %3567 = vmatpush3.bf16.msra.mxu0 %v3564_v51 }
 0x637   :  { %3407 = vmatmul.mubr.msk.f32.vlgmr.msra.gmra.mrb[12].mxu1 %vm438_vm3, %v945_v55  ;;  %v3088_v55 = vld [vmem:[#allocation11 + $0x18] sm:$0xff] }
 0x638   :  { %3415 = vmatpush3.msra.mxu1 %v1113_v37  ;;  %3416 = vmatprep.mubr.msk.f32.mxu1 %vm3833_vm1, %v3832_v16 }
 0x639   :  { %3424 = vmatprep.subr.mxu1 %v3832_v16 }
 0x63b   :  { %3417 = vmatmul.mubr.msk.f32.vlgmr.msra.gmra.mrb[14].mxu1 %vm438_vm3, %v1111_v21  ;;  %v3568_v21 = vpack.c.bf16 %v3088_v55, %v3087_v54 }
 0x63c   :  { %3425 = vmatpush3.msra.mxu1 %v1279_v62  ;;  %3426 = vmatprep.mubr.msk.f32.mxu1 %vm3833_vm1, %v3832_v16 }
 0x63d   :  { %3434 = vmatprep.subr.mxu1 %v3832_v16  ;;  %3569 = vmatprep.subr.bf16.mxu0 %v3568_v21 }
 0x63e   :  { %3571 = vmatpush3.bf16.msra.mxu0 %v3568_v21 }
 0x63f   :  { %3427 = vmatmul.mubr.msk.f32.vlgmr.msra.gmra.mrb[16].mxu1 %vm438_vm3, %v1277_v25 }
 0x640   :  { %3435 = vmatpush3.msra.mxu1 %v1445_v61  ;;  %3436 = vmatprep.mubr.msk.f32.mxu1 %vm3833_vm1, %v3832_v16 }
 0x641   :  { %3444 = vmatprep.subr.mxu1 %v3832_v16 }
 0x643   :  { %3437 = vmatmul.mubr.msk.f32.vlgmr.msra.gmra.mrb[18].mxu1 %vm438_vm3, %v1443_v29 }
 0x644   :  { %3445 = vmatpush3.msra.mxu1 %v1611_v2  ;;  %3446 = vmatprep.mubr.msk.f32.mxu1 %vm3833_vm1, %v3832_v16 }
 0x645   :  { %3454 = vmatprep.subr.mxu1 %v3832_v16 }
 0x647   :  { %3447 = vmatmul.mubr.msk.f32.vlgmr.msra.gmra.mrb[20].mxu1 %vm438_vm3, %v1609_v34 }
 0x648   :  { %3455 = vmatpush3.msra.mxu1 %v4041_v36  ;;  %3456 = vmatprep.mubr.msk.f32.mxu1 %vm3833_vm1, %v3832_v16  ;;  %v3647_v36 = vpop.eup %3646 }
 0x649   :  { %3464 = vmatprep.subr.mxu1 %v3832_v16  ;;  %v1976_v19 = vmul.f32 %v3647_v36, %v4250_v58  ;;  %v3649_v52 = vpop.eup %3648 }
 0x64a   :  { %v2143_v8 = vmul.f32 %v3649_v52, %v4254_v60  ;;  %v3651_v13 = vpop.eup %3650 }
 0x64b   :  { %3457 = vmatmul.mubr.msk.f32.vlgmr.msra.gmra.mrb[22].mxu1 %vm438_vm3, %v1813_v42  ;;  %v2309_v58 = vmul.f32 %v3651_v13, %v4258_v0  ;;  %v3653_v18 = vpop.eup %3652 }
 0x64c   :  { %3466 = vmatprep.mubr.msk.f32.mxu1 %vm3833_vm1, %v3832_v16  ;;  %v2475_v60 = vmul.f32 %v3653_v18, %v4263_v3 }
 0x656   :  { %v2639_v47 = vpop.xlane.xlu1 %2638 }
 0x657   :  { %3654 = vrcp.f32 %v2639_v47 }
 0x65a   :  { %v2805_v5 = vpop.xlane.xlu1 %2804 }
 0x65b   :  { %3656 = vrcp.f32 %v2805_v5 }
 0x65c   :  { %3658 = vrcp.f32 %v2971_v14 }
 0x65e   :  { %v1979_v7 = vpop.permute.xlu1 %1978 }
 0x65f   :  { %3465 = vmatpush3.msra.mxu1 %v1979_v7 }
 0x660   :  { %3467 = vmatmul.mubr.msk.f32.vlgmr.msra.gmra.mrb[24].mxu1 %vm438_vm3, %v1976_v19  ;;  %3474 = vmatprep.subr.mxu1 %v3832_v16 }
 0x661   :  { %3476 = vmatprep.mubr.msk.f32.mxu1 %vm3833_vm1, %v3832_v16  ;;  %v3655_v22 = vpop.eup %3654 }
 0x662   :  { %v2145_v9 = vpop.permute.xlu1 %2144  ;;  %v2641_v0 = vmul.f32 %v3655_v22, %v4290_v39 }
 0x663   :  { %3475 = vmatpush3.msra.mxu1 %v2145_v9 }
 0x664   :  { %3477 = vmatmul.mubr.msk.f32.vlgmr.msra.gmra.mrb[26].mxu1 %vm438_vm3, %v2143_v8  ;;  %3484 = vmatprep.subr.mxu1 %v3832_v16 }
 0x665   :  { %3486 = vmatprep.mubr.msk.f32.mxu1 %vm3833_vm1, %v3832_v16  ;;  %v3657_v6 = vpop.eup %3656 }
 0x666   :  { %v2311_v15 = vpop.permute.xlu1 %2310  ;;  %v2807_v3 = vmul.f32 %v3657_v6, %v4294_v31  ;;  %v3659_v26 = vpop.eup %3658 }
 0x667   :  { %3485 = vmatpush3.msra.mxu1 %v2311_v15  ;;  %v2973_v17 = vmul.f32 %v3659_v26, %v4273_v11 }
 0x668   :  { %3487 = vmatmul.mubr.msk.f32.vlgmr.msra.gmra.mrb[28].mxu1 %vm438_vm3, %v2309_v58  ;;  %3494 = vmatprep.subr.mxu1 %v3832_v16 }
 0x669   :  { %3496 = vmatprep.mubr.msk.f32.mxu1 %vm3833_vm1, %v3832_v16 }
 0x66a   :  { %v2477_v20 = vpop.permute.xlu1 %2476 }
 0x66b   :  { %3495 = vmatpush3.msra.mxu1 %v2477_v20 }
 0x66c   :  { %3497 = vmatmul.mubr.msk.f32.vlgmr.msra.gmra.mrb[30].mxu1 %vm438_vm3, %v2475_v60  ;;  %3504 = vmatprep.subr.mxu1 %v3832_v16 }
 0x66d   :  { %3506 = vmatprep.mubr.msk.f32.mxu1 %vm3833_vm1, %v3832_v16 }
 0x66e   :  { %v2643_v24 = vpop.permute.xlu1 %2642 }
 0x66f   :  { %3505 = vmatpush3.msra.mxu1 %v2643_v24 }
 0x670   :  { %3507 = vmatmul.mubr.msk.f32.vlgmr.msra.gmra.mrb[32].mxu1 %vm438_vm3, %v2641_v0  ;;  %3514 = vmatprep.subr.mxu1 %v3832_v16 }
 0x671   :  { %3515 = vmatpush3.msra.mxu1 %v2809_v63  ;;  %3516 = vmatprep.mubr.msk.f32.mxu1 %vm3833_vm1, %v3832_v16 }
 0x672   :  { %v2975_v10 = vpop.permute.xlu1 %2974  ;;  %3524 = vmatprep.subr.mxu1 %v3832_v16 }
 0x674   :  { %3517 = vmatmul.mubr.msk.f32.vlgmr.msra.gmra.mrb[34].mxu1 %vm438_vm3, %v2807_v3 }
 0x675   :  { %3525 = vmatpush3.msra.mxu1 %v2975_v10  ;;  %3526 = vmatprep.mubr.msk.f32.mxu1 %vm3833_vm1, %v3832_v16 }
 0x678   :  { %3527 = vmatmul.mubr.msk.f32.vlgmr.msra.gmra.mrb[36].mxu1 %vm438_vm3, %v2973_v17 }
 0x702   :  { %v686_v28 = vpop.f32.mrb[8].mxu1 }
 0x703   :  { %1687 = vrot.lane.b32.xlu1 %v686_v28, %s3841_s25  ;;  %v3388_v23 = vpop.f32.mrb[9].mxu1 }
 0x706   :  { %v852_v30 = vpop.f32.mrb[10].mxu1 }
 0x707   :  { %1691 = vrot.lane.b32.xlu1 %v852_v30, %s3827_s10  ;;  %v3398_v32 = vpop.f32.mrb[11].mxu1 }
 0x70a   :  { %v1018_v33 = vpop.f32.mrb[12].mxu1 }
 0x70b   :  { %1695 = vrot.lane.b32.xlu1 %v1018_v33, %s3842_s27  ;;  %v3408_v27 = vpop.f32.mrb[13].mxu1 }
 0x70e   :  { %v1184_v38 = vpop.f32.mrb[14].mxu1 }
 0x70f   :  { %1699 = vrot.lane.b32.xlu1 %v1184_v38, %s3843_s28  ;;  %v3418_v16 = vpop.f32.mrb[15].mxu1 }
 0x712   :  { %v1350_v11 = vpop.f32.mrb[16].mxu1 }
 0x713   :  { %1703 = vrot.lane.b32.xlu1 %v1350_v11, %s3844_s29  ;;  %v3428_v39 = vpop.f32.mrb[17].mxu1 }
 0x716   :  { %v1516_v40 = vpop.f32.mrb[18].mxu1 }
 0x717   :  { %1707 = vrot.lane.b32.xlu1 %v1516_v40, %s3845_s30  ;;  %v3438_v31 = vpop.f32.mrb[19].mxu1 }
 0x71a   :  { %v1682_v43 = vpop.f32.mrb[20].mxu1 }
 0x71b   :  { %v3448_v37 = vpop.f32.mrb[21].mxu1 }
 0x71e   :  { %v1883_v62 = vpop.f32.mrb[22].mxu1 }
 0x71f   :  { %v3458_v1 = vpop.f32.mrb[23].mxu1 }
 0x733   :  { %v2050_v44 = vpop.f32.mrb[24].mxu1 }
 0x734   :  { %3051 = vrot.lane.b32.xlu1 %v2050_v44, %s3841_s25  ;;  %v3468_v46 = vpop.f32.mrb[25].mxu1 }
 0x737   :  { %v2216_v50 = vpop.f32.mrb[26].mxu1 }
 0x738   :  { %1711 = vrot.lane.b32.xlu1 %v1682_v43, %s3846_s7  ;;  %3055 = vrot.lane.b32.xlu0 %v2216_v50, %s3827_s10  ;;  %v3478_v41 = vpop.f32.mrb[27].mxu1 }
 0x73b   :  { %v2382_v56 = vpop.f32.mrb[28].mxu1 }
 0x73c   :  { %3059 = vrot.lane.b32.xlu0 %v2382_v56, %s3842_s27  ;;  %v3488_v45 = vpop.f32.mrb[29].mxu1 }
 0x73f   :  { %v2548_v57 = vpop.f32.mrb[30].mxu1 }
 0x740   :  { %3063 = vrot.lane.b32.xlu0 %v2548_v57, %s3843_s28  ;;  %v3498_v25 = vpop.f32.mrb[31].mxu1 }
 0x743   :  { %v2714_v59 = vpop.f32.mrb[32].mxu1 }
 0x744   :  { %3067 = vrot.lane.b32.xlu0 %v2714_v59, %s3844_s29  ;;  %v3508_v49 = vpop.f32.mrb[33].mxu1 }
 0x747   :  { %v2880_v61 = vpop.f32.mrb[34].mxu1 }
 0x748   :  { %3071 = vrot.lane.b32.xlu0 %v2880_v61, %s3845_s30  ;;  %v3518_v29 = vpop.f32.mrb[35].mxu1 }
 0x74b   :  { %v3046_v53 = vpop.f32.mrb[36].mxu1 }
 0x74c   :  { %3075 = vrot.lane.b32.xlu1 %v3046_v53, %s3846_s7  ;;  %v3528_v2 = vpop.f32.mrb[37].mxu1 }
 0x775   :  { %v1688_v34 = vpop.permute.xlu1 %1687 }
 0x776   :  { %v1714_v19 = vsel %vm360_vm2, %v4148_v12, %v1688_v34 }
 0x779   :  { %v1692_v4 = vpop.permute.xlu1 %1691 }
 0x77a   :  { %v1715_v7 = vsel %vm438_vm3, %v1714_v19, %v1692_v4 }
 0x77d   :  { %v1696_v42 = vpop.permute.xlu1 %1695 }
 0x77e   :  { %v1717_v8 = vsel %vm1716_vm4, %v1715_v7, %v1696_v42 }
 0x781   :  { %v1700_v47 = vpop.permute.xlu1 %1699 }
 0x782   :  { %v1719_v9 = vsel %vm1718_vm5, %v1717_v8, %v1700_v47 }
 0x785   :  { %v1704_v5 = vpop.permute.xlu1 %1703 }
 0x786   :  { %v1721_v13 = vsel %vm1720_vm6, %v1719_v9, %v1704_v5 }
 0x789   :  { %v1708_v36 = vpop.permute.xlu1 %1707 }
 0x78a   :  { %v1723_v58 = vsel %vm1722_vm7, %v1721_v13, %v1708_v36 }
 0x7a6   :  { %v3052_v52 = vpop.permute.xlu1 %3051 }
 0x7a7   :  { %v3078_v22 = vsel %vm360_vm2, %v1883_v62, %v3052_v52 }
 0x7aa   :  { %v1712_v14 = vpop.permute.xlu1 %1711  ;;  %v3056_v15 = vpop.permute.xlu0 %3055 }
 0x7ab   :  { %v1725_v18 = vsel %vm1724_vm8, %v1723_v58, %v1712_v14  ;;  %v3079_v0 = vsel %vm438_vm3, %v3078_v22, %v3056_v15 }
 0x7ac   :  { %3537 = vmatprep.mubr.msk.f32.mxu0 %vm112_vm0, %v1725_v18 }
 0x7ae   :  { %v3060_v12 = vpop.permute.xlu0 %3059 }
 0x7af   :  { %v3080_v24 = vsel %vm1716_vm4, %v3079_v0, %v3060_v12 }
 0x7b2   :  { %v3064_v60 = vpop.permute.xlu0 %3063 }
 0x7b3   :  { %v3081_v63 = vsel %vm1718_vm5, %v3080_v24, %v3064_v60 }
 0x7b6   :  { %v3068_v20 = vpop.permute.xlu0 %3067 }
 0x7b7   :  { %v3082_v3 = vsel %vm1720_vm6, %v3081_v63, %v3068_v20 }
 0x7ba   :  { %v3072_v6 = vpop.permute.xlu0 %3071 }
 0x7bb   :  { %v3083_v10 = vsel %vm1722_vm7, %v3082_v3, %v3072_v6 }
 0x7be   :  { %v3076_v26 = vpop.permute.xlu1 %3075 }
 0x7bf   :  { %v3084_v17 = vsel %vm1724_vm8, %v3083_v10, %v3076_v26 }
 0x7c0   :  { %3538 = vmatmul.mubr.msk.f32.vlgmr.msra.gmra.mrb[32].mxu0 %vm112_vm0, %v3084_v17 }
 0x893   :  { %v3539_v28 = vpop.f32.mrb[32].mxu0 }
 0x894   :  { %3171 = vst.msk [vmem:[#allocation13 + $0x8] sm:$0xff] %vm112_vm0, %v3539_v28  ;;  %v3161_v23 = vpop.f32.mrb[33].mxu0 }
 0x895   :  { %3170 = vst.msk [vmem:[#allocation13] sm:$0xff] %vm112_vm0, %v3161_v23 }
 0x896   :  { %3803 = shalt.err (!%p3800_p10)
}
 0x897   :  { %s3804_s24 = scalar_lea.hbm %s4434_s6, 256 }
 0x898   :  { %p3805_p11 = scmp.ne.s32.totalorder %s4434_s6, %s3804_s24  ;;  %p3808_p12 = scmp.lt.u32.totalorder %s3804_s24, %s4434_s6 }
 0x89a   :  { %p3810_p13 = pnand %p3808_p12, %p3805_p11 }
 0x89c   :  { %3813 = shalt.err (!%p3810_p13)
}
 0x89d   :  { %3183 = dma.vmem_to_hbm [thread:$0]  %s3178_s11, 256, %s4434_s6, [#allocation4], %s3826_s9, %s3826_s9, %s3827_s10  }
 0x89e   :  { %3822 = dma.done.wait [#allocation4], 256  }
 0x89f   :  { %3823 = vsyncadd [#allocation4], 4294967040 }
 0x8a0   :  { %3187 = vsyncpa [#allocation3], 1 }
 0x8a1   :  { %3188 = vsyncpa [#allocation6], 1 }
 0x8a2   :  { %3189 = vsyncpa [#allocation9], 1 }
 0x8a3   :  { %3190 = vsyncpa [#allocation12], 1 }
 0x8a4   :  { %3191 = vsyncpa [#allocation4], 1 }

</bundles_post_ra>
